<compile_context>
chip_gen: v6e
topology: v6e:2x2x1
jax: 0.10.0
libtpu: 0.0.40
codegen_flags: <defaults>
</compile_context>

<pallas_src>
import jax
import jax.numpy as jnp
from jax.experimental import pallas as pl
from jax.experimental.pallas import tpu as pltpu


def neg_kernel(xs_ref, w_ref, b_ref, o_ref):
    # Leaf predicate f(xs) = sigmoid(xs @ W + b): MXU matmul (f32 accum) + EUP.
    z = jnp.dot(xs_ref[...], w_ref[...], preferred_element_type=jnp.float32)
    z = z + b_ref[...]
    # Neg: 1 - sigmoid(z) == sigmoid(-z)  (well-conditioned for large z;
    # single extra VPU negate, free under the HBM roofline).
    o_ref[...] = jax.nn.sigmoid(-z)


def _pick_tile_n(N, tile_n):
    """Sublane-aligned N tile. Big tiles for roofline, but keep >=4 grid steps
    (>=2 per TensorCore on v7x) whenever tiles can stay >=512 rows."""
    if N <= tile_n:
        return N  # single full-extent block (always a legal block shape)
    tn = max(8, (tile_n // 8) * 8)
    while N // tn < 4 and tn >= 1024:
        tn //= 2
    return tn


def neg_forward(xs, w, b, *, tile_n=1024):
    """out[n, k] = 1 - sigmoid(xs @ W + b)[n, k]"""
    N, D = xs.shape
    K = w.shape[1]

    tn = _pick_tile_n(N, tile_n)
    grid_n = pl.cdiv(N, tn)  # ragged last block handled by Pallas masking

    cost = pl.CostEstimate(
        flops=2 * N * D * K,
        transcendentals=2 * N * K,  # exp + reciprocal per sigmoid element
        bytes_accessed=4 * (N * D + D * K + K + N * K),
    )

    out = pl.pallas_call(
        neg_kernel,
        out_shape=jax.ShapeDtypeStruct((N, K), jnp.float32),
        grid_spec=pl.GridSpec(
            grid=(grid_n,),
            in_specs=[
                pl.BlockSpec((tn, D), lambda i: (i, 0)),   # xs: pipelined over N
                pl.BlockSpec((D, K), lambda i: (0, 0)),    # W: VMEM-resident
                pl.BlockSpec((1, K), lambda i: (0, 0)),    # b: VMEM-resident
            ],
            out_specs=pl.BlockSpec((tn, K), lambda i: (i, 0)),
        ),
        compiler_params=pltpu.CompilerParams(
            # Independent N-tiles -> shardable across v7x's 2 TensorCores.
            dimension_semantics=("parallel",),
            vmem_limit_bytes=32 * 1024 * 1024,
        ),
        cost_estimate=cost,
    )(xs, w, b)
    return out


def neg_reference(xs, w, b):
    return 1.0 - jax.nn.sigmoid(xs @ w + b)


if __name__ == "__main__":
    # N deliberately NOT a multiple of the tile so the ragged (no-pad) last
    # block path is exercised; 1024-row tiles give 5 grid steps (>=2 per TC
    # on v7x) and sit at the ~86%-of-roofline tiling point.
    N, D, K = 4100, 128, 128

    key = jax.random.PRNGKey(0)
    k_xs, k_w, k_b = jax.random.split(key, 3)

    xs = jax.random.normal(k_xs, (N, D), dtype=jnp.float32)
    w = jax.random.normal(k_w, (D, K), dtype=jnp.float32) * 0.1
    b = jax.random.normal(k_b, (1, K), dtype=jnp.float32) * 0.1

    out = neg_forward(xs, w, b, tile_n=1024)
    out = jax.block_until_ready(out)

    ref = neg_reference(xs, w, b)
    assert out.shape == (N, K)
    assert jnp.allclose(out, ref, atol=1e-5, rtol=1e-5), "mismatch vs reference"

    print("KERNEL_OK")
</pallas_src>

<mosaic_0001>
module attributes {stable_mosaic.version = 11 : i64} {
  func.func @neg_kernel(%arg0: i32, %arg1: memref<1024x128xf32, #tpu.memory_space<vmem>>, %arg2: memref<128x128xf32, #tpu.memory_space<vmem>>, %arg3: memref<1x128xf32, #tpu.memory_space<vmem>>, %arg4: memref<1024x128xf32, #tpu.memory_space<vmem>>) attributes {dimension_semantics = [#tpu.dimension_semantics<parallel>], iteration_bounds = array<i64: 5>, scalar_prefetch = 0 : i64, scratch_operands = 0 : i64, tpu.core_type = #tpu.core_type<tc>, window_params = [{transform_indices = @transform_0, window_bounds = array<i64: 1024, 128>}, {pipeline_mode = #tpu.pipeline_mode<synchronous>, transform_indices = @transform_1, window_bounds = array<i64: 128, 128>}, {pipeline_mode = #tpu.pipeline_mode<synchronous>, transform_indices = @transform_2, window_bounds = array<i64: 1, 128>}, {transform_indices = @transform_3, window_bounds = array<i64: 1024, 128>}]} {
    %c0 = arith.constant 0 : index
    %c0_0 = arith.constant 0 : index
    %0 = vector.load %arg1[%c0, %c0_0] : memref<1024x128xf32, #tpu.memory_space<vmem>>, vector<1024x128xf32>
    %c0_1 = arith.constant 0 : index
    %c0_2 = arith.constant 0 : index
    %1 = vector.load %arg2[%c0_1, %c0_2] : memref<128x128xf32, #tpu.memory_space<vmem>>, vector<128x128xf32>
    %cst = arith.constant dense<0.000000e+00> : vector<1024x128xf32>
    %2 = tpu.matmul %0, %1, %cst {dimension_numbers = #tpu.dot_dimension_numbers<[1], [0], [0], [1], [0, 0, 1, 1], [], []>} : vector<1024x128xf32>, vector<128x128xf32>, vector<1024x128xf32> -> vector<1024x128xf32>
    %c0_3 = arith.constant 0 : index
    %c0_4 = arith.constant 0 : index
    %3 = vector.load %arg3[%c0_3, %c0_4] : memref<1x128xf32, #tpu.memory_space<vmem>>, vector<1x128xf32>
    %4 = vector.broadcast %3 : vector<1x128xf32> to vector<1024x128xf32>
    %5 = arith.addf %2, %4 : vector<1024x128xf32>
    %cst_5 = arith.constant 0.000000e+00 : f32
    %6 = vector.broadcast %cst_5 : f32 to vector<1024x128xf32>
    %7 = arith.subf %6, %5 : vector<1024x128xf32>
    %8 = arith.negf %7 : vector<1024x128xf32>
    %9 = math.exp %8 : vector<1024x128xf32>
    %cst_6 = arith.constant 1.000000e+00 : f32
    %10 = vector.broadcast %cst_6 : f32 to vector<1024x128xf32>
    %11 = arith.addf %10, %9 : vector<1024x128xf32>
    %12 = arith.divf %10, %11 : vector<1024x128xf32>
    %c0_7 = arith.constant 0 : index
    %c0_8 = arith.constant 0 : index
    %13 = vector.load %arg4[%c0_7, %c0_8] : memref<1024x128xf32, #tpu.memory_space<vmem>>, vector<1024x128xf32>
    tpu.vector_store %arg4[%c0_7, %c0_8], %12 {strides = array<i32>} : memref<1024x128xf32, #tpu.memory_space<vmem>>, vector<1024x128xf32>,
    return
  }
  func.func @transform_0(%arg0: i32) -> (i32, i32) {
    %c0_i32 = arith.constant 0 : i32
    %c0_i32_0 = arith.constant 0 : i32
    return %arg0, %c0_i32 : i32, i32
  }
  func.func @transform_1(%arg0: i32) -> (i32, i32) {
    %c0_i32 = arith.constant 0 : i32
    %c0_i32_0 = arith.constant 0 : i32
    %c0_i32_1 = arith.constant 0 : i32
    return %c0_i32, %c0_i32_0 : i32, i32
  }
  func.func @transform_2(%arg0: i32) -> (i32, i32) {
    %c0_i32 = arith.constant 0 : i32
    %c0_i32_0 = arith.constant 0 : i32
    %c0_i32_1 = arith.constant 0 : i32
    return %c0_i32, %c0_i32_0 : i32, i32
  }
  func.func @transform_3(%arg0: i32) -> (i32, i32) {
    %c0_i32 = arith.constant 0 : i32
    %c0_i32_0 = arith.constant 0 : i32
    return %arg0, %c0_i32 : i32, i32
  }
}

</mosaic_0001>

<bundles_post_ra>
// kernel: tpu_custom_call.1
= control target key start
LH: loop header
LB: loop body
LE: loop exit
PB: predicated region body
PF: predicated region fallthrough
CT: control target
= control target key end

     0   :  { %8 = vsyncpa [#allocation3], 0  ;;  %s4150_s0 = inlined_call_operand.hbm [shape: f32[4100,128], index: 0, kind: input, shape index: {}]   ;;  %s4151_s1 = inlined_call_operand.hbm [shape: f32[128,128], index: 1, kind: input, shape index: {}]   ;;  %s4152_s2 = inlined_call_operand.hbm [shape: f32[1,128], index: 2, kind: input, shape index: {}]   ;;  %s4153_s3 = inlined_call_operand.hbm [shape: f32[4100,128], index: 3, kind: output, shape index: {}]  }
   0x1   :  { %10 = vsyncpa [#allocation3 + $0x1], 0 }
   0x2   :  { %11 = vsyncpa [#allocation6], 0 }
   0x3   :  { %12 = vsyncpa [#allocation4], 0 }
   0x4   :  { %14 = vsyncpa [#allocation4 + $0x1], 0  ;;  %s3539_s12 = smov 0   ;;  %s3541_s13 = smov 0  }
   0x5   :  { %s3543_s14 = smov 0   ;;  %s3545_s15 = smov 0  }
   0x6 LB: > { %s3560_s16 = sadd.s32 4294967295, %s3507_s15   ;;  %s2224_s17 = sadd.s32 4294967294, %s3507_s15   ;;  %s3507_s15 = sphi %s3545_s15, %s4168_s15   ;;  %s3503_s14 = sphi %s3543_s14, %s4167_s14   ;;  %s3499_s13 = sphi %s3541_s13, %s4166_s13   ;;  %s3495_s12 = sphi %s3539_s12, %s4165_s12  }
   0x7   : > { %s3564_s18 = sadd.s32 1, %s3507_s15   ;;  %s27_s19 = sadd.s32 1, %s3503_s14 }
   0x8   : > { %s24_s20 = ssub.s32 %s3507_s15, %s3564_s18  ;;  %p34_p0 = scmp.ne.s32.totalorder %s3503_s14, %s3499_s13 }
   0x9   : > { %p25_p1 = scmp.eq.s32.totalorder %s24_s20, 0  ;;  %p35_p2 = scmp.eq.s32.totalorder %s3507_s15, 0 }
   0xa   : > { %p40_p3 = scmp.ne.s32.totalorder %s3499_s13, %s3495_s12  ;;  %p4154_p4 = scmp.eq.s32.totalorder %s3560_s16, 0 }
   0xb   : > { %s3576_s21 = scalar_select %p25_p1, %s3503_s14, %s27_s19  }
   0xc   : > { %p3578_p5 = por %p35_p2, %p34_p0  ;;  %p3584_p6 = por %p4154_p4, %p40_p3 }
   0xd   : > { %p106_p7 = scmp.eq.s32.totalorder %s3560_s16, 4  ;;  %p112_p8 = scmp.eq.s32.totalorder %s2224_s17, 4 }
   0xe   : > { %p2225_p9 = scmp.ge.s32.totalorder %s3507_s15, 1  ;;  %p119_p10 = scmp.lt.s32.totalorder %s3507_s15, 6 }
   0xf   : > { %p3591_p11 = por %p106_p7, %p34_p0  ;;  %p3595_p12 = por %p112_p8, %p40_p3 }
  0x10   : > { %p3599_p13 = pnand %p2225_p9, %p119_p10  ;;  %s3509_s27 = smov [#allocation5]  }
  0x11   : > { %s4157_s24 = scalar_select %p3591_p11, 1, 0 }
  0x12   : > { %s4158_s25 = scalar_select %p3595_p12, 1, 0 }
  0x13   : > { %p2791_p1 = pneg %p3599_p13  ;;  %s131_s28 = sshll.u32 %s3509_s27, 4  ;;  %s132_s28 = int_to_ptr.vmem [resolvable:$true] %s131_s28 }
  0x14   : > { %s3510_s30 = smov [#allocation7]   ;;  %s3372_s5 = scalar_lea.vmem %s132_s28, 2048 }
  0x15   : > { %p3607_p2 = pnand %p2791_p1, %p4154_p4  ;;  %s145_s4 = sshll.u32 %s3510_s30, 4  ;;  %s146_s4 = int_to_ptr.vmem [resolvable:$true] %s145_s4 }
  0x16   : > { %p3373_p3 = scmp.ne.s32.totalorder %s132_s28, %s3372_s5  ;;  %p3380_p9 = scmp.lt.s32.totalorder %s132_s28, %s132_s28 }
  0x17   : > { %p3363_p0 = pneg %p3607_p2  ;;  %p3381_p10 = scmp.lt.s32.totalorder %s3372_s5, %s3372_s5 }
  0x19   : > { %p3375_p7 = pnand %p3373_p3, %p3363_p0  ;;  %p3382_p12 = por %p3381_p10, %p3380_p9 }
  0x1b   : > { %p3376_p8 = pneg %p3375_p7 }
  0x1d   : > { %p3383_p1 = pnand %p3382_p12, %p3376_p8 }
  0x1f   : > { %3386 = shalt.err (!%p3383_p1)
}
  0x20   : > { %s3511_s6 = smov 128   ;;  %s3512_s7 = smov 8  }
  0x21   : > { %2794 = dma.hbm_to_vmem [thread:$0]  (!%p3607_p2), %s4151_s1, 2048, %s132_s28, [#allocation6], %s3511_s6, %s3511_s6, %s3512_s7  }
  0x22   : > { %s3398_s10 = scalar_lea.vmem %s146_s4, 16  ;;  %s3405_s11 = scalar_lea.vmem %s146_s4, 32 }
  0x23   : > { %p3399_p4 = scmp.ne.s32.totalorder %s146_s4, %s3398_s10  ;;  %p3406_p11 = scmp.lt.s32.totalorder %s146_s4, %s146_s4 }
  0x24   : > { %p3407_p9 = scmp.lt.s32.totalorder %s3405_s11, %s3398_s10 }
  0x25   : > { %p3401_p3 = pnand %p3399_p4, %p3363_p0 }
  0x26   : > { %p3408_p12 = por %p3407_p9, %p3406_p11 }
  0x27   : > { %p3402_p7 = pneg %p3401_p3 }
  0x29   : > { %p3409_p8 = pnand %p3408_p12, %p3402_p7 }
  0x2b   : > { %3412 = shalt.err (!%p3409_p8)
}
  0x2c   : > { %2797 = dma.hbm_to_vmem [thread:$0]  (!%p3607_p2), %s4152_s2, 16, %s146_s4, [#allocation6]  }
  0x2d   : > { %p2228_p10 = scmp.ge.s32.totalorder %s3507_s15, 5 }
  0x2f   : > { %152 = sbr.rel (%p2228_p10) target bundleno = 84 (0x54), region = 24 }
  0x34   : > { %155 = sbr.rel (!%p3578_p5) target bundleno = 84 (0x54), region = 28  ;;  %s156_s20 = sand.u32 (%p3578_p5), 1, %s3503_s14  }
  0x35   : > { %s2230_s27 = sshll.u32 (%p3578_p5), %s3507_s15, 7  ;;  %s2229_s28 = sshll.u32 (%p3578_p5), %s156_s20, 10 }
  0x36   : > { %s162_s30 = ssub.s32 (%p3578_p5), 513, %s2230_s27  ;;  %s3637_s6 = scalar_lea.sflag (%p3578_p5), [#allocation3], %s156_s20 }
  0x37   : > { %p163_p4 = scmp.lt.s32.totalorder (%p3578_p5), %s162_s30, 128  ;;  %s160_s4 = scalar_lea.vmem (%p3578_p5), [#allocation2], %s2229_s28 }
  0x39   : > { %s4170_s30 = smov (!%p163_p4, %s162_s30), 128 }
  0x3a   : > { %s3634_s5 = sshll.u32 %s4170_s30, 7 }
  0x3b   : > { %s167_s29 = ssub.s32 16384, %s3634_s5 }
  0x3c   : > { %168 = vsyncadd %s3637_s6, %s167_s29  ;;  %p2232_p5 = scmp.ne.s32.totalorder %s3634_s5, 0  ;;  %s2379_s22 = sshll.u32 %s3507_s15, 14 }
  0x3d   : > { %s3645_s9 = scalar_lea.hbm %s4150_s0, %s2379_s22  ;;  %s173_s10 = sshll.u32 %s160_s4, 4  ;;  %s3647_s10 = int_to_ptr.vmem [resolvable:$true] %s173_s10 }
  0x3e   : > { %s3413_s11 = scalar_lea.hbm %s3645_s9, %s3634_s5  ;;  %s3417_s20 = scalar_lea.hbm %s4150_s0, 65664 }
  0x3f   : > { %p3414_p11 = scmp.ne.s32.totalorder %s3645_s9, %s3413_s11  ;;  %p3418_p1 = scmp.lt.s32.totalorder %s3645_s9, %s4150_s0 }
  0x40   : > { %p3419_p3 = scmp.lt.s32.totalorder %s3417_s20, %s3413_s11 }
  0x41   : > { %p3415_p2 = pnand %p3414_p11, %p2232_p5 }
  0x42   : > { %p3420_p7 = por %p3419_p3, %p3418_p1 }
  0x43   : > { %p3416_p0 = pneg %p3415_p2 }
  0x45   : > { %p3421_p9 = pnand %p3420_p7, %p3416_p0 }
  0x47   : > { %3424 = shalt.err (!%p3421_p9)
}
  0x48   : > { %s3425_s30 = scalar_lea.vmem %s3647_s10, %s3634_s5  ;;  %s3513_s29 = smov [#allocation2]  }
  0x49   : > { %p3426_p12 = scmp.ne.s32.totalorder %s3647_s10, %s3425_s30  ;;  %s3429_s4 = sshll.u32 %s3513_s29, 4  ;;  %s3430_s4 = int_to_ptr.vmem [resolvable:$false] %s3429_s4 }
  0x4a   : > { %s3431_s22 = scalar_lea.vmem %s3430_s4, 32768  ;;  %p3432_p4 = scmp.lt.s32.totalorder %s3647_s10, %s3430_s4 }
  0x4b   : > { %p3427_p8 = pnand %p3426_p12, %p2232_p5  ;;  %p3433_p11 = scmp.lt.s32.totalorder %s3431_s22, %s3425_s30 }
  0x4d   : > { %p3428_p10 = pneg %p3427_p8  ;;  %p3434_p2 = por %p3433_p11, %p3432_p4 }
  0x4f   : > { %p3435_p1 = pnand %p3434_p2, %p3428_p10 }
  0x51   : > { %3438 = shalt.err (!%p3435_p1)
}
  0x52   : > { %s3514_s7 = smov 128   ;;  %s3515_s8 = smov 8  }
  0x53   : > { %179 = dma.hbm_to_vmem [thread:$0]  (%p2232_p5), %s3645_s9, %s3634_s5, %s3647_s10, %s3637_s6, %s3514_s7, %s3514_s7, %s3515_s8  }
  0x54 PF: > { %185 = sbr.rel (%p3599_p13) target bundleno = 628 (0x274), region = 32  ;;  %s3676_s11 = sand.u32 (!%p3599_p13), 1, %s3499_s13  }
  0x55   : > { %s2237_s17 = sshll.u32 (!%p3599_p13), %s3676_s11, 10  ;;  %s188_s19 = scalar_lea.sflag (!%p3599_p13), [#allocation3], %s3676_s11 }
  0x56   : > { %s3682_s20 = scalar_lea.vmem (!%p3599_p13), [#allocation2], %s2237_s17 }
  0x59   : > { %3482 = dma.done.wait (%p3584_p6), %s188_s19, 16384  }
  0x5a   : > { %3484 = vsyncadd (%p3584_p6), %s188_s19, 4294950912  ;;  %p4161_p5 = scmp.eq.s32.totalorder %s3560_s16, 0 }
  0x5c   : > { %3486 = dma.done.wait (%p4161_p5), [#allocation6], 2064   ;;  %p4162_p13 = pmov %p4161_p5 }
  0x5d   : > { %v375_v0 = vld [vmem:[#allocation5 + $0x78] sm:$0xff]  ;;  %v374_v1 = vld [vmem:[#allocation5 + $0x70] sm:$0xff]  ;;  %v373_v2 = vld [vmem:[#allocation5 + $0x68] sm:$0xff]  ;;  %s3849_s23 = scalar_lea.vmem [#allocation8], %s2237_s17  ;;  %s2113_s26 = scalar_lea.sflag [#allocation4], %s3676_s11 }
  0x5e   : > { %3488 = vsyncadd (%p4162_p13), [#allocation6], 4294965232  ;;  %2525 = vmatprep.subr.mxu0 %v375_v0  ;;  %2749 = vmatprep.subr.mxu1 %v375_v0  ;;  %v372_v3 = vld [vmem:[#allocation5 + $0x60] sm:$0xff]  ;;  %v371_v4 = vld [vmem:[#allocation5 + $0x58] sm:$0xff]  ;;  %p4163_p6 = scmp.ne.s32.totalorder %s4157_s24, 0 }
  0x5f   : > { %2526 = vmatpush3.msra.mxu0 %v375_v0  ;;  %2765 = vmatpush3.msra.mxu1 %v375_v0  ;;  %v370_v5 = vld [vmem:[#allocation5 + $0x50] sm:$0xff]  ;;  %v369_v6 = vld [vmem:[#allocation5 + $0x48] sm:$0xff]  ;;  %v368_v7 = vld [vmem:[#allocation5 + $0x40] sm:$0xff]  ;;  %s2371_s5 = sshll.u32 (%p4163_p6), %s3560_s16, 7 }
  0x60   : > { %2527 = vmatprep.subr.mxu0 %v374_v1  ;;  %2750 = vmatprep.subr.mxu1 %v374_v1  ;;  %v367_v8 = vld [vmem:[#allocation5 + $0x38] sm:$0xff]  ;;  %v366_v9 = vld [vmem:[#allocation5 + $0x30] sm:$0xff]  ;;  %v365_v10 = vld [vmem:[#allocation5 + $0x28] sm:$0xff]  ;;  %s2121_s6 = ssub.s32 (%p4163_p6), 513, %s2371_s5 }
  0x61   : > { %2528 = vmatpush3.msra.mxu0 %v374_v1  ;;  %2766 = vmatpush3.msra.mxu1 %v374_v1  ;;  %v364_v11 = vld [vmem:[#allocation5 + $0x20] sm:$0xff]  ;;  %v363_v12 = vld [vmem:[#allocation5 + $0x18] sm:$0xff]  ;;  %v362_v13 = vld [vmem:[#allocation5 + $0x10] sm:$0xff]  ;;  %p2122_p0 = scmp.lt.s32.totalorder (%p4163_p6), %s2121_s6, 128 }
  0x62   : > { %2529 = vmatprep.subr.mxu0 %v373_v2  ;;  %2751 = vmatprep.subr.mxu1 %v373_v2  ;;  %v361_v14 = vld [vmem:[#allocation5 + $0x8] sm:$0xff]  ;;  %v360_v15 = vld [vmem:[#allocation5] sm:$0xff]  ;;  %v234_v20 = vld [vmem:[%s3682_s20 + $0x10] sm:$0xff] }
  0x63   : > { %2530 = vmatpush3.msra.mxu0 %v373_v2  ;;  %2767 = vmatpush3.msra.mxu1 %v373_v2  ;;  %v232_v16 = vld [vmem:[%s3682_s20] sm:$0xff]  ;;  %v233_v18 = vld [vmem:[%s3682_s20 + $0x8] sm:$0xff]  ;;  %v298_v21 = vld [vmem:[%s3682_s20 + $0x210] sm:$0xff] }
  0x64   : > { %2531 = vmatprep.subr.mxu0 %v372_v3  ;;  %2752 = vmatprep.subr.mxu1 %v372_v3  ;;  %v296_v17 = vld [vmem:[%s3682_s20 + $0x200] sm:$0xff]  ;;  %v297_v19 = vld [vmem:[%s3682_s20 + $0x208] sm:$0xff]  ;;  %v235_v22 = vld [vmem:[%s3682_s20 + $0x18] sm:$0xff] }
  0x65   : > { %2532 = vmatpush3.msra.mxu0 %v372_v3  ;;  %2768 = vmatpush3.msra.mxu1 %v372_v3  ;;  %v299_v23 = vld [vmem:[%s3682_s20 + $0x218] sm:$0xff]  ;;  %v236_v24 = vld [vmem:[%s3682_s20 + $0x20] sm:$0xff]  ;;  %v237_v26 = vld [vmem:[%s3682_s20 + $0x28] sm:$0xff] }
  0x66   : > { %2533 = vmatprep.subr.mxu0 %v371_v4  ;;  %2753 = vmatprep.subr.mxu1 %v371_v4  ;;  %v300_v25 = vld [vmem:[%s3682_s20 + $0x220] sm:$0xff]  ;;  %v301_v27 = vld [vmem:[%s3682_s20 + $0x228] sm:$0xff]  ;;  %v238_v28 = vld [vmem:[%s3682_s20 + $0x30] sm:$0xff] }
  0x67   : > { %2534 = vmatpush3.msra.mxu0 %v371_v4  ;;  %2769 = vmatpush3.msra.mxu1 %v371_v4  ;;  %v302_v29 = vld [vmem:[%s3682_s20 + $0x230] sm:$0xff]  ;;  %v239_v30 = vld [vmem:[%s3682_s20 + $0x38] sm:$0xff]  ;;  %v240_v32 = vld [vmem:[%s3682_s20 + $0x40] sm:$0xff] }
  0x68   : > { %2535 = vmatprep.subr.mxu0 %v370_v5  ;;  %2754 = vmatprep.subr.mxu1 %v370_v5  ;;  %v303_v31 = vld [vmem:[%s3682_s20 + $0x238] sm:$0xff]  ;;  %v304_v33 = vld [vmem:[%s3682_s20 + $0x240] sm:$0xff]  ;;  %v241_v34 = vld [vmem:[%s3682_s20 + $0x48] sm:$0xff] }
  0x69   : > { %2536 = vmatpush3.msra.mxu0 %v370_v5  ;;  %2770 = vmatpush3.msra.mxu1 %v370_v5  ;;  %v305_v35 = vld [vmem:[%s3682_s20 + $0x248] sm:$0xff]  ;;  %v242_v36 = vld [vmem:[%s3682_s20 + $0x50] sm:$0xff]  ;;  %v243_v38 = vld [vmem:[%s3682_s20 + $0x58] sm:$0xff] }
  0x6a   : > { %2537 = vmatprep.subr.mxu0 %v369_v6  ;;  %2755 = vmatprep.subr.mxu1 %v369_v6  ;;  %v306_v37 = vld [vmem:[%s3682_s20 + $0x250] sm:$0xff]  ;;  %v307_v39 = vld [vmem:[%s3682_s20 + $0x258] sm:$0xff]  ;;  %v244_v40 = vld [vmem:[%s3682_s20 + $0x60] sm:$0xff] }
  0x6b   : > { %2538 = vmatpush3.msra.mxu0 %v369_v6  ;;  %2771 = vmatpush3.msra.mxu1 %v369_v6  ;;  %v308_v41 = vld [vmem:[%s3682_s20 + $0x260] sm:$0xff]  ;;  %v245_v42 = vld [vmem:[%s3682_s20 + $0x68] sm:$0xff]  ;;  %v246_v44 = vld [vmem:[%s3682_s20 + $0x70] sm:$0xff] }
  0x6c   : > { %2539 = vmatprep.subr.mxu0 %v368_v7  ;;  %2756 = vmatprep.subr.mxu1 %v368_v7  ;;  %v309_v43 = vld [vmem:[%s3682_s20 + $0x268] sm:$0xff]  ;;  %v310_v45 = vld [vmem:[%s3682_s20 + $0x270] sm:$0xff]  ;;  %v247_v46 = vld [vmem:[%s3682_s20 + $0x78] sm:$0xff] }
  0x6d   : > { %2540 = vmatpush3.msra.mxu0 %v368_v7  ;;  %2772 = vmatpush3.msra.mxu1 %v368_v7  ;;  %v311_v47 = vld [vmem:[%s3682_s20 + $0x278] sm:$0xff]  ;;  %v248_v48 = vld [vmem:[%s3682_s20 + $0x80] sm:$0xff]  ;;  %v249_v50 = vld [vmem:[%s3682_s20 + $0x88] sm:$0xff] }
  0x6e   : > { %2541 = vmatprep.subr.mxu0 %v367_v8  ;;  %2757 = vmatprep.subr.mxu1 %v367_v8  ;;  %v312_v49 = vld [vmem:[%s3682_s20 + $0x280] sm:$0xff]  ;;  %v313_v51 = vld [vmem:[%s3682_s20 + $0x288] sm:$0xff]  ;;  %v250_v52 = vld [vmem:[%s3682_s20 + $0x90] sm:$0xff] }
  0x6f   : > { %2542 = vmatpush3.msra.mxu0 %v367_v8  ;;  %2773 = vmatpush3.msra.mxu1 %v367_v8  ;;  %v314_v53 = vld [vmem:[%s3682_s20 + $0x290] sm:$0xff]  ;;  %v251_v54 = vld [vmem:[%s3682_s20 + $0x98] sm:$0xff]  ;;  %v252_v56 = vld [vmem:[%s3682_s20 + $0xa0] sm:$0xff] }
  0x70   : > { %2543 = vmatprep.subr.mxu0 %v366_v9  ;;  %2758 = vmatprep.subr.mxu1 %v366_v9  ;;  %v315_v55 = vld [vmem:[%s3682_s20 + $0x298] sm:$0xff]  ;;  %v316_v57 = vld [vmem:[%s3682_s20 + $0x2a0] sm:$0xff]  ;;  %v253_v58 = vld [vmem:[%s3682_s20 + $0xa8] sm:$0xff] }
  0x71   : > { %2544 = vmatpush3.msra.mxu0 %v366_v9  ;;  %2774 = vmatpush3.msra.mxu1 %v366_v9  ;;  %v317_v59 = vld [vmem:[%s3682_s20 + $0x2a8] sm:$0xff]  ;;  %v254_v60 = vld [vmem:[%s3682_s20 + $0xb0] sm:$0xff]  ;;  %v255_v62 = vld [vmem:[%s3682_s20 + $0xb8] sm:$0xff] }
  0x72   : > { %2545 = vmatprep.subr.mxu0 %v365_v10  ;;  %2759 = vmatprep.subr.mxu1 %v365_v10  ;;  %v318_v61 = vld [vmem:[%s3682_s20 + $0x2b0] sm:$0xff]  ;;  %v319_v63 = vld [vmem:[%s3682_s20 + $0x2b8] sm:$0xff]  ;;  %v256_v0 = vld [vmem:[%s3682_s20 + $0xc0] sm:$0xff] }
  0x73   : > { %2546 = vmatpush3.msra.mxu0 %v365_v10  ;;  %2775 = vmatpush3.msra.mxu1 %v365_v10  ;;  %v320_v1 = vld [vmem:[%s3682_s20 + $0x2c0] sm:$0xff]  ;;  %v257_v2 = vld [vmem:[%s3682_s20 + $0xc8] sm:$0xff]  ;;  %v258_v4 = vld [vmem:[%s3682_s20 + $0xd0] sm:$0xff] }
  0x74   : > { %2547 = vmatprep.subr.mxu0 %v364_v11  ;;  %2760 = vmatprep.subr.mxu1 %v364_v11  ;;  %v321_v3 = vld [vmem:[%s3682_s20 + $0x2c8] sm:$0xff]  ;;  %v322_v5 = vld [vmem:[%s3682_s20 + $0x2d0] sm:$0xff]  ;;  %v259_v6 = vld [vmem:[%s3682_s20 + $0xd8] sm:$0xff] }
  0x75   : > { %2548 = vmatpush3.msra.mxu0 %v364_v11  ;;  %2776 = vmatpush3.msra.mxu1 %v364_v11  ;;  %v323_v7 = vld [vmem:[%s3682_s20 + $0x2d8] sm:$0xff]  ;;  %v260_v8 = vld [vmem:[%s3682_s20 + $0xe0] sm:$0xff]  ;;  %v261_v10 = vld [vmem:[%s3682_s20 + $0xe8] sm:$0xff] }
  0x76   : > { %2549 = vmatprep.subr.mxu0 %v363_v12  ;;  %2761 = vmatprep.subr.mxu1 %v363_v12  ;;  %v324_v9 = vld [vmem:[%s3682_s20 + $0x2e0] sm:$0xff]  ;;  %v325_v11 = vld [vmem:[%s3682_s20 + $0x2e8] sm:$0xff] }
  0x77   : > { %2550 = vmatpush3.msra.mxu0 %v363_v12  ;;  %2777 = vmatpush3.msra.mxu1 %v363_v12  ;;  %v262_v12 = vld [vmem:[%s3682_s20 + $0xf0] sm:$0xff] }
  0x78   : > { %2551 = vmatprep.subr.mxu0 %v362_v13  ;;  %2762 = vmatprep.subr.mxu1 %v362_v13 }
  0x79   : > { %2552 = vmatpush3.msra.mxu0 %v362_v13  ;;  %2778 = vmatpush3.msra.mxu1 %v362_v13  ;;  %v326_v13 = vld [vmem:[%s3682_s20 + $0x2f0] sm:$0xff] }
  0x7a   : > { %2553 = vmatprep.subr.mxu0 %v361_v14  ;;  %2763 = vmatprep.subr.mxu1 %v361_v14 }
  0x7b   : > { %2554 = vmatpush3.msra.mxu0 %v361_v14  ;;  %2779 = vmatpush3.msra.mxu1 %v361_v14  ;;  %v263_v14 = vld [vmem:[%s3682_s20 + $0xf8] sm:$0xff] }
  0x7c   : > { %2555 = vmatprep.subr.mxu0 %v360_v15  ;;  %2764 = vmatprep.subr.mxu1 %v360_v15 }
  0x7d   : > { %2556 = vmatpush3.msra.mxu0 %v360_v15  ;;  %2780 = vmatpush3.msra.mxu1 %v360_v15  ;;  %v327_v15 = vld [vmem:[%s3682_s20 + $0x2f8] sm:$0xff] }
  0x7e   : > { %2557 = vmatprep.mubr.f32.mxu0 %v232_v16  ;;  %2653 = vmatprep.mubr.f32.mxu1 %v296_v17  ;;  %v264_v16 = vld [vmem:[%s3682_s20 + $0x100] sm:$0xff] }
  0x7f   : > { %2558 = vmatmul.mubr.f32.vlgmr.msra.gmra.mxu0 %v233_v18  ;;  %2654 = vmatmul.mubr.f32.vlgmr.msra.gmra.mxu1 %v297_v19  ;;  %v328_v17 = vld [vmem:[%s3682_s20 + $0x300] sm:$0xff]  ;;  %v265_v18 = vld [vmem:[%s3682_s20 + $0x108] sm:$0xff] }
  0x80   : > { %2560 = vmatprep.mubr.f32.mxu0 %v234_v20  ;;  %2656 = vmatprep.mubr.f32.mxu1 %v298_v21  ;;  %v329_v19 = vld [vmem:[%s3682_s20 + $0x308] sm:$0xff]  ;;  %v266_v20 = vld [vmem:[%s3682_s20 + $0x110] sm:$0xff] }
  0x81   : > { %v330_v21 = vld [vmem:[%s3682_s20 + $0x310] sm:$0xff] }
  0x83   : > { %2561 = vmatmul.mubr.f32.gmra.mxu0 %v235_v22  ;;  %2657 = vmatmul.mubr.f32.gmra.mxu1 %v299_v23  ;;  %v267_v22 = vld [vmem:[%s3682_s20 + $0x118] sm:$0xff] }
  0x84   : > { %2563 = vmatprep.mubr.f32.mxu0 %v236_v24  ;;  %2659 = vmatprep.mubr.f32.mxu1 %v300_v25  ;;  %v331_v23 = vld [vmem:[%s3682_s20 + $0x318] sm:$0xff]  ;;  %v268_v24 = vld [vmem:[%s3682_s20 + $0x120] sm:$0xff] }
  0x85   : > { %v332_v25 = vld [vmem:[%s3682_s20 + $0x320] sm:$0xff] }
  0x87   : > { %2564 = vmatmul.mubr.f32.gmra.mxu0 %v237_v26  ;;  %2660 = vmatmul.mubr.f32.gmra.mxu1 %v301_v27  ;;  %v269_v26 = vld [vmem:[%s3682_s20 + $0x128] sm:$0xff] }
  0x88   : > { %2566 = vmatprep.mubr.f32.mxu0 %v238_v28  ;;  %2662 = vmatprep.mubr.f32.mxu1 %v302_v29  ;;  %v333_v27 = vld [vmem:[%s3682_s20 + $0x328] sm:$0xff]  ;;  %v270_v28 = vld [vmem:[%s3682_s20 + $0x130] sm:$0xff] }
  0x89   : > { %v334_v29 = vld [vmem:[%s3682_s20 + $0x330] sm:$0xff] }
  0x8b   : > { %2567 = vmatmul.mubr.f32.gmra.mxu0 %v239_v30  ;;  %2663 = vmatmul.mubr.f32.gmra.mxu1 %v303_v31  ;;  %v271_v30 = vld [vmem:[%s3682_s20 + $0x138] sm:$0xff] }
  0x8c   : > { %2569 = vmatprep.mubr.f32.mxu0 %v240_v32  ;;  %2665 = vmatprep.mubr.f32.mxu1 %v304_v33  ;;  %v335_v31 = vld [vmem:[%s3682_s20 + $0x338] sm:$0xff]  ;;  %v272_v32 = vld [vmem:[%s3682_s20 + $0x140] sm:$0xff] }
  0x8d   : > { %v336_v33 = vld [vmem:[%s3682_s20 + $0x340] sm:$0xff] }
  0x8f   : > { %2570 = vmatmul.mubr.f32.gmra.mxu0 %v241_v34  ;;  %2666 = vmatmul.mubr.f32.gmra.mxu1 %v305_v35  ;;  %v273_v34 = vld [vmem:[%s3682_s20 + $0x148] sm:$0xff] }
  0x90   : > { %2572 = vmatprep.mubr.f32.mxu0 %v242_v36  ;;  %2668 = vmatprep.mubr.f32.mxu1 %v306_v37  ;;  %v337_v35 = vld [vmem:[%s3682_s20 + $0x348] sm:$0xff]  ;;  %v274_v36 = vld [vmem:[%s3682_s20 + $0x150] sm:$0xff] }
  0x91   : > { %v338_v37 = vld [vmem:[%s3682_s20 + $0x350] sm:$0xff] }
  0x93   : > { %2573 = vmatmul.mubr.f32.gmra.mxu0 %v243_v38  ;;  %2669 = vmatmul.mubr.f32.gmra.mxu1 %v307_v39  ;;  %v275_v38 = vld [vmem:[%s3682_s20 + $0x158] sm:$0xff] }
  0x94   : > { %2575 = vmatprep.mubr.f32.mxu0 %v244_v40  ;;  %2671 = vmatprep.mubr.f32.mxu1 %v308_v41  ;;  %v339_v39 = vld [vmem:[%s3682_s20 + $0x358] sm:$0xff]  ;;  %v276_v40 = vld [vmem:[%s3682_s20 + $0x160] sm:$0xff] }
  0x95   : > { %v340_v41 = vld [vmem:[%s3682_s20 + $0x360] sm:$0xff] }
  0x97   : > { %2576 = vmatmul.mubr.f32.gmra.mxu0 %v245_v42  ;;  %2672 = vmatmul.mubr.f32.gmra.mxu1 %v309_v43  ;;  %v277_v42 = vld [vmem:[%s3682_s20 + $0x168] sm:$0xff] }
  0x98   : > { %2578 = vmatprep.mubr.f32.mxu0 %v246_v44  ;;  %2674 = vmatprep.mubr.f32.mxu1 %v310_v45  ;;  %v341_v43 = vld [vmem:[%s3682_s20 + $0x368] sm:$0xff]  ;;  %v278_v44 = vld [vmem:[%s3682_s20 + $0x170] sm:$0xff] }
  0x99   : > { %v342_v45 = vld [vmem:[%s3682_s20 + $0x370] sm:$0xff] }
  0x9b   : > { %2579 = vmatmul.mubr.f32.gmra.mxu0 %v247_v46  ;;  %2675 = vmatmul.mubr.f32.gmra.mxu1 %v311_v47  ;;  %v279_v46 = vld [vmem:[%s3682_s20 + $0x178] sm:$0xff] }
  0x9c   : > { %2581 = vmatprep.mubr.f32.mxu0 %v248_v48  ;;  %2677 = vmatprep.mubr.f32.mxu1 %v312_v49  ;;  %v343_v47 = vld [vmem:[%s3682_s20 + $0x378] sm:$0xff]  ;;  %v280_v48 = vld [vmem:[%s3682_s20 + $0x180] sm:$0xff] }
  0x9d   : > { %v344_v49 = vld [vmem:[%s3682_s20 + $0x380] sm:$0xff] }
  0x9f   : > { %2582 = vmatmul.mubr.f32.gmra.mxu0 %v249_v50  ;;  %2678 = vmatmul.mubr.f32.gmra.mxu1 %v313_v51  ;;  %v281_v50 = vld [vmem:[%s3682_s20 + $0x188] sm:$0xff] }
  0xa0   : > { %2584 = vmatprep.mubr.f32.mxu0 %v250_v52  ;;  %2680 = vmatprep.mubr.f32.mxu1 %v314_v53  ;;  %v345_v51 = vld [vmem:[%s3682_s20 + $0x388] sm:$0xff]  ;;  %v282_v52 = vld [vmem:[%s3682_s20 + $0x190] sm:$0xff] }
  0xa1   : > { %v346_v53 = vld [vmem:[%s3682_s20 + $0x390] sm:$0xff] }
  0xa3   : > { %2585 = vmatmul.mubr.f32.gmra.mxu0 %v251_v54  ;;  %2681 = vmatmul.mubr.f32.gmra.mxu1 %v315_v55  ;;  %v283_v54 = vld [vmem:[%s3682_s20 + $0x198] sm:$0xff] }
  0xa4   : > { %2587 = vmatprep.mubr.f32.mxu0 %v252_v56  ;;  %2683 = vmatprep.mubr.f32.mxu1 %v316_v57  ;;  %v347_v55 = vld [vmem:[%s3682_s20 + $0x398] sm:$0xff]  ;;  %v284_v56 = vld [vmem:[%s3682_s20 + $0x1a0] sm:$0xff] }
  0xa5   : > { %v348_v57 = vld [vmem:[%s3682_s20 + $0x3a0] sm:$0xff] }
  0xa7   : > { %2588 = vmatmul.mubr.f32.gmra.mxu0 %v253_v58  ;;  %2684 = vmatmul.mubr.f32.gmra.mxu1 %v317_v59  ;;  %v285_v58 = vld [vmem:[%s3682_s20 + $0x1a8] sm:$0xff] }
  0xa8   : > { %2590 = vmatprep.mubr.f32.mxu0 %v254_v60  ;;  %2686 = vmatprep.mubr.f32.mxu1 %v318_v61  ;;  %v349_v59 = vld [vmem:[%s3682_s20 + $0x3a8] sm:$0xff]  ;;  %v286_v60 = vld [vmem:[%s3682_s20 + $0x1b0] sm:$0xff] }
  0xa9   : > { %v350_v61 = vld [vmem:[%s3682_s20 + $0x3b0] sm:$0xff] }
  0xab   : > { %2591 = vmatmul.mubr.f32.gmra.mxu0 %v255_v62  ;;  %2687 = vmatmul.mubr.f32.gmra.mxu1 %v319_v63  ;;  %v287_v62 = vld [vmem:[%s3682_s20 + $0x1b8] sm:$0xff] }
  0xac   : > { %2593 = vmatprep.mubr.f32.mxu0 %v256_v0  ;;  %2689 = vmatprep.mubr.f32.mxu1 %v320_v1  ;;  %v351_v63 = vld [vmem:[%s3682_s20 + $0x3b8] sm:$0xff]  ;;  %v288_v0 = vld [vmem:[%s3682_s20 + $0x1c0] sm:$0xff] }
  0xad   : > { %v352_v1 = vld [vmem:[%s3682_s20 + $0x3c0] sm:$0xff] }
  0xaf   : > { %2594 = vmatmul.mubr.f32.gmra.mxu0 %v257_v2  ;;  %2690 = vmatmul.mubr.f32.gmra.mxu1 %v321_v3  ;;  %v289_v2 = vld [vmem:[%s3682_s20 + $0x1c8] sm:$0xff] }
  0xb0   : > { %2596 = vmatprep.mubr.f32.mxu0 %v258_v4  ;;  %2692 = vmatprep.mubr.f32.mxu1 %v322_v5  ;;  %v353_v3 = vld [vmem:[%s3682_s20 + $0x3c8] sm:$0xff]  ;;  %v290_v4 = vld [vmem:[%s3682_s20 + $0x1d0] sm:$0xff] }
  0xb1   : > { %v354_v5 = vld [vmem:[%s3682_s20 + $0x3d0] sm:$0xff] }
  0xb3   : > { %2597 = vmatmul.mubr.f32.gmra.mxu0 %v259_v6  ;;  %2693 = vmatmul.mubr.f32.gmra.mxu1 %v323_v7  ;;  %v291_v6 = vld [vmem:[%s3682_s20 + $0x1d8] sm:$0xff] }
  0xb4   : > { %2599 = vmatprep.mubr.f32.mxu0 %v260_v8  ;;  %2695 = vmatprep.mubr.f32.mxu1 %v324_v9  ;;  %v355_v7 = vld [vmem:[%s3682_s20 + $0x3d8] sm:$0xff]  ;;  %v292_v8 = vld [vmem:[%s3682_s20 + $0x1e0] sm:$0xff] }
  0xb5   : > { %v356_v9 = vld [vmem:[%s3682_s20 + $0x3e0] sm:$0xff] }
  0xb7   : > { %2600 = vmatmul.mubr.f32.gmra.mxu0 %v261_v10  ;;  %2696 = vmatmul.mubr.f32.gmra.mxu1 %v325_v11  ;;  %v293_v10 = vld [vmem:[%s3682_s20 + $0x1e8] sm:$0xff] }
  0xb8   : > { %2602 = vmatprep.mubr.f32.mxu0 %v262_v12  ;;  %2698 = vmatprep.mubr.f32.mxu1 %v326_v13  ;;  %v357_v11 = vld [vmem:[%s3682_s20 + $0x3e8] sm:$0xff]  ;;  %v294_v12 = vld [vmem:[%s3682_s20 + $0x1f0] sm:$0xff] }
  0xb9   : > { %v358_v13 = vld [vmem:[%s3682_s20 + $0x3f0] sm:$0xff] }
  0xbb   : > { %2603 = vmatmul.mubr.f32.gmra.mxu0 %v263_v14  ;;  %2699 = vmatmul.mubr.f32.gmra.mxu1 %v327_v15  ;;  %v295_v14 = vld [vmem:[%s3682_s20 + $0x1f8] sm:$0xff] }
  0xbc   : > { %2605 = vmatprep.mubr.f32.mxu0 %v264_v16  ;;  %2701 = vmatprep.mubr.f32.mxu1 %v328_v17  ;;  %v359_v15 = vld [vmem:[%s3682_s20 + $0x3f8] sm:$0xff]  ;;  %v3820_v16 = vld [vmem:[#allocation7] ss:$0 sm:$0xff] }
  0xbf   : > { %2606 = vmatmul.mubr.f32.gmra.mxu0 %v265_v18  ;;  %2702 = vmatmul.mubr.f32.gmra.mxu1 %v329_v19 }
  0xc0   : > { %2608 = vmatprep.mubr.f32.mxu0 %v266_v20  ;;  %2704 = vmatprep.mubr.f32.mxu1 %v330_v21 }
  0xc3   : > { %2609 = vmatmul.mubr.f32.gmra.mxu0 %v267_v22  ;;  %2705 = vmatmul.mubr.f32.gmra.mxu1 %v331_v23 }
  0xc4   : > { %2611 = vmatprep.mubr.f32.mxu0 %v268_v24  ;;  %2707 = vmatprep.mubr.f32.mxu1 %v332_v25 }
  0xc7   : > { %2612 = vmatmul.mubr.f32.gmra.mxu0 %v269_v26  ;;  %2708 = vmatmul.mubr.f32.gmra.mxu1 %v333_v27 }
  0xc8   : > { %2614 = vmatprep.mubr.f32.mxu0 %v270_v28  ;;  %2710 = vmatprep.mubr.f32.mxu1 %v334_v29 }
  0xcb   : > { %2615 = vmatmul.mubr.f32.gmra.mxu0 %v271_v30  ;;  %2711 = vmatmul.mubr.f32.gmra.mxu1 %v335_v31 }
  0xcc   : > { %2617 = vmatprep.mubr.f32.mxu0 %v272_v32  ;;  %2713 = vmatprep.mubr.f32.mxu1 %v336_v33 }
  0xcf   : > { %2618 = vmatmul.mubr.f32.gmra.mxu0 %v273_v34  ;;  %2714 = vmatmul.mubr.f32.gmra.mxu1 %v337_v35 }
  0xd0   : > { %2620 = vmatprep.mubr.f32.mxu0 %v274_v36  ;;  %2716 = vmatprep.mubr.f32.mxu1 %v338_v37 }
  0xd3   : > { %2621 = vmatmul.mubr.f32.gmra.mxu0 %v275_v38  ;;  %2717 = vmatmul.mubr.f32.gmra.mxu1 %v339_v39 }
  0xd4   : > { %2623 = vmatprep.mubr.f32.mxu0 %v276_v40  ;;  %2719 = vmatprep.mubr.f32.mxu1 %v340_v41 }
  0xd7   : > { %2624 = vmatmul.mubr.f32.gmra.mxu0 %v277_v42  ;;  %2720 = vmatmul.mubr.f32.gmra.mxu1 %v341_v43 }
  0xd8   : > { %2626 = vmatprep.mubr.f32.mxu0 %v278_v44  ;;  %2722 = vmatprep.mubr.f32.mxu1 %v342_v45 }
  0xdb   : > { %2627 = vmatmul.mubr.f32.gmra.mxu0 %v279_v46  ;;  %2723 = vmatmul.mubr.f32.gmra.mxu1 %v343_v47 }
  0xdc   : > { %2629 = vmatprep.mubr.f32.mxu0 %v280_v48  ;;  %2725 = vmatprep.mubr.f32.mxu1 %v344_v49 }
  0xdf   : > { %2630 = vmatmul.mubr.f32.gmra.mxu0 %v281_v50  ;;  %2726 = vmatmul.mubr.f32.gmra.mxu1 %v345_v51 }
  0xe0   : > { %2632 = vmatprep.mubr.f32.mxu0 %v282_v52  ;;  %2728 = vmatprep.mubr.f32.mxu1 %v346_v53 }
  0xe3   : > { %2633 = vmatmul.mubr.f32.gmra.mxu0 %v283_v54  ;;  %2729 = vmatmul.mubr.f32.gmra.mxu1 %v347_v55 }
  0xe4   : > { %2635 = vmatprep.mubr.f32.mxu0 %v284_v56  ;;  %2731 = vmatprep.mubr.f32.mxu1 %v348_v57 }
  0xe7   : > { %2636 = vmatmul.mubr.f32.gmra.mxu0 %v285_v58  ;;  %2732 = vmatmul.mubr.f32.gmra.mxu1 %v349_v59 }
  0xe8   : > { %2638 = vmatprep.mubr.f32.mxu0 %v286_v60  ;;  %2734 = vmatprep.mubr.f32.mxu1 %v350_v61 }
  0xeb   : > { %2639 = vmatmul.mubr.f32.gmra.mxu0 %v287_v62  ;;  %2735 = vmatmul.mubr.f32.gmra.mxu1 %v351_v63 }
  0xec   : > { %2641 = vmatprep.mubr.f32.mxu0 %v288_v0  ;;  %2737 = vmatprep.mubr.f32.mxu1 %v352_v1 }
  0xef   : > { %2642 = vmatmul.mubr.f32.gmra.mxu0 %v289_v2  ;;  %2738 = vmatmul.mubr.f32.gmra.mxu1 %v353_v3 }
  0xf0   : > { %2644 = vmatprep.mubr.f32.mxu0 %v290_v4  ;;  %2740 = vmatprep.mubr.f32.mxu1 %v354_v5 }
  0xf3   : > { %2645 = vmatmul.mubr.f32.gmra.mxu0 %v291_v6  ;;  %2741 = vmatmul.mubr.f32.gmra.mxu1 %v355_v7 }
  0xf4   : > { %2647 = vmatprep.mubr.f32.mxu0 %v292_v8  ;;  %2743 = vmatprep.mubr.f32.mxu1 %v356_v9 }
  0xf7   : > { %2648 = vmatmul.mubr.f32.gmra.mxu0 %v293_v10  ;;  %2744 = vmatmul.mubr.f32.gmra.mxu1 %v357_v11 }
  0xf8   : > { %2650 = vmatprep.mubr.f32.mxu0 %v294_v12  ;;  %2746 = vmatprep.mubr.f32.mxu1 %v358_v13 }
  0xfb   : > { %2651 = vmatmul.mubr.f32.gmra.mxu0 %v295_v14  ;;  %2747 = vmatmul.mubr.f32.gmra.mxu1 %v359_v15 }
 0x13f   : > { %v2559_v17 = vpop.f32.mrf.mxu0  ;;  %v2655_v18 = vpop.f32.mrf.mxu1 }
 0x140   : > { %v455_v19 = vadd.f32 %v2559_v17, %v3820_v16  ;;  %v775_v20 = vadd.f32 %v2655_v18, %v3820_v16 }
 0x141   : > { %v449_v21 = vpop.f32.mrf.mxu0  ;;  %v769_v22 = vpop.f32.mrf.mxu1 }
 0x142   : > { %v1089_v23 = vsub.f32 0.0, %v455_v19  ;;  %v1153_v24 = vsub.f32 0.0, %v775_v20  ;;  %v450_v25 = vadd.f32 %v3820_v16, %v449_v21  ;;  %v770_v26 = vadd.f32 %v3820_v16, %v769_v22 }
 0x143   : > { %v2562_v27 = vpop.f32.mrf.mxu0  ;;  %v2658_v28 = vpop.f32.mrf.mxu1 }
 0x144   : > { %v2243_v29 = vmul.f32 -1.442695, %v1089_v23  ;;  %v2307_v30 = vmul.f32 -1.442695, %v1153_v24  ;;  %v1088_v31 = vsub.f32 0.0, %v450_v25  ;;  %v1152_v32 = vsub.f32 0.0, %v770_v26 }
 0x145   : > { %v465_v33 = vadd.f32 %v2562_v27, %v3820_v16  ;;  %v785_v34 = vadd.f32 %v2658_v28, %v3820_v16  ;;  %v459_v35 = vpop.f32.mrf.mxu0  ;;  %v779_v36 = vpop.f32.mrf.mxu1 }
 0x146   : > { %2847 = vpow2.f32 %v2243_v29  ;;  %v2242_v37 = vmul.f32 -1.442695, %v1088_v31  ;;  %v2306_v38 = vmul.f32 -1.442695, %v1152_v32  ;;  %v460_v39 = vadd.f32 %v3820_v16, %v459_v35 }
 0x147   : > { %2849 = vpow2.f32 %v2307_v30  ;;  %v1091_v40 = vsub.f32 0.0, %v465_v33  ;;  %v1155_v41 = vsub.f32 0.0, %v785_v34  ;;  %v780_v42 = vadd.f32 %v3820_v16, %v779_v36  ;;  %v2565_v43 = vpop.f32.mrf.mxu0  ;;  %v2661_v44 = vpop.f32.mrf.mxu1 }
 0x148   : > { %2851 = vpow2.f32 %v2242_v37  ;;  %v1090_v45 = vsub.f32 0.0, %v460_v39  ;;  %v475_v46 = vadd.f32 %v2565_v43, %v3820_v16  ;;  %v795_v47 = vadd.f32 %v2661_v44, %v3820_v16 }
 0x149   : > { %2853 = vpow2.f32 %v2306_v38  ;;  %v2245_v48 = vmul.f32 -1.442695, %v1091_v40  ;;  %v2309_v49 = vmul.f32 -1.442695, %v1155_v41  ;;  %v1154_v50 = vsub.f32 0.0, %v780_v42  ;;  %v469_v51 = vpop.f32.mrf.mxu0  ;;  %v789_v52 = vpop.f32.mrf.mxu1 }
 0x14a   : > { %v2244_v53 = vmul.f32 -1.442695, %v1090_v45  ;;  %v1093_v54 = vsub.f32 0.0, %v475_v46  ;;  %v1157_v55 = vsub.f32 0.0, %v795_v47  ;;  %v470_v56 = vadd.f32 %v3820_v16, %v469_v51 }
 0x14b   : > { %2855 = vpow2.f32 %v2245_v48  ;;  %v2308_v57 = vmul.f32 -1.442695, %v1154_v50  ;;  %v790_v58 = vadd.f32 %v3820_v16, %v789_v52  ;;  %v2568_v59 = vpop.f32.mrf.mxu0  ;;  %v2664_v60 = vpop.f32.mrf.mxu1 }
 0x14c   : > { %2857 = vpow2.f32 %v2309_v49  ;;  %v2247_v61 = vmul.f32 -1.442695, %v1093_v54  ;;  %v2311_v62 = vmul.f32 -1.442695, %v1157_v55  ;;  %v1092_v63 = vsub.f32 0.0, %v470_v56 }
 0x14d   : > { %2859 = vpow2.f32 %v2244_v53  ;;  %v1156_v0 = vsub.f32 0.0, %v790_v58  ;;  %v485_v1 = vadd.f32 %v2568_v59, %v3820_v16  ;;  %v805_v2 = vadd.f32 %v2664_v60, %v3820_v16  ;;  %v479_v3 = vpop.f32.mrf.mxu0  ;;  %v799_v4 = vpop.f32.mrf.mxu1 }
 0x14e   : > { %2861 = vpow2.f32 %v2308_v57  ;;  %v2246_v5 = vmul.f32 -1.442695, %v1092_v63  ;;  %v480_v6 = vadd.f32 %v3820_v16, %v479_v3  ;;  %v800_v7 = vadd.f32 %v3820_v16, %v799_v4 }
 0x14f   : > { %2863 = vpow2.f32 %v2247_v61  ;;  %v2310_v8 = vmul.f32 -1.442695, %v1156_v0  ;;  %v1095_v9 = vsub.f32 0.0, %v485_v1  ;;  %v1159_v10 = vsub.f32 0.0, %v805_v2  ;;  %v2571_v11 = vpop.f32.mrf.mxu0  ;;  %v2667_v12 = vpop.f32.mrf.mxu1 }
 0x150   : > { %2865 = vpow2.f32 %v2311_v62  ;;  %v1094_v13 = vsub.f32 0.0, %v480_v6  ;;  %v1158_v20 = vsub.f32 0.0, %v800_v7  ;;  %v495_v33 = vadd.f32 %v2571_v11, %v3820_v16 }
 0x151   : > { %2867 = vpow2.f32 %v2246_v5  ;;  %v2249_v14 = vmul.f32 -1.442695, %v1095_v9  ;;  %v2313_v15 = vmul.f32 -1.442695, %v1159_v10  ;;  %v489_v17 = vpop.f32.mrf.mxu0  ;;  %v809_v18 = vpop.f32.mrf.mxu1  ;;  %v815_v35 = vadd.f32 %v2667_v12, %v3820_v16 }
 0x152   : > { %2869 = vpow2.f32 %v2310_v8  ;;  %v2248_v19 = vmul.f32 -1.442695, %v1094_v13  ;;  %v2312_v30 = vmul.f32 -1.442695, %v1158_v20  ;;  %v1097_v44 = vsub.f32 0.0, %v495_v33 }
 0x153   : > { %v2848_v21 = vpop.eup %2847  ;;  %2871 = vpow2.f32 %v2249_v14  ;;  %v2574_v22 = vpop.f32.mrf.mxu0  ;;  %v1161_v47 = vsub.f32 0.0, %v815_v35  ;;  %v490_v48 = vadd.f32 %v3820_v16, %v489_v17  ;;  %v810_v51 = vadd.f32 %v3820_v16, %v809_v18 }
 0x154   : > { %v2850_v23 = vpop.eup %2849  ;;  %v1601_v24 = vadd.f32 1.0, %v2848_v21  ;;  %2873 = vpow2.f32 %v2313_v15  ;;  %v2670_v27 = vpop.f32.mrf.mxu1  ;;  %v505_v55 = vadd.f32 %v2574_v22, %v3820_v16  ;;  %v2251_v59 = vmul.f32 -1.442695, %v1097_v44 }
 0x155   : > { %v2852_v25 = vpop.eup %2851  ;;  %v1665_v26 = vadd.f32 1.0, %v2850_v23  ;;  %2875 = vpow2.f32 %v2248_v19  ;;  %v499_v31 = vpop.f32.mrf.mxu0  ;;  %v825_v60 = vadd.f32 %v2670_v27, %v3820_v16  ;;  %v2315_v63 = vmul.f32 -1.442695, %v1161_v47 }
 0x156   : > { %v2854_v28 = vpop.eup %2853  ;;  %2877 = vrcp.f32 %v1601_v24  ;;  %v1600_v29 = vadd.f32 1.0, %v2852_v25  ;;  %v819_v38 = vpop.f32.mrf.mxu1  ;;  %v1096_v0 = vsub.f32 0.0, %v490_v48  ;;  %v1160_v3 = vsub.f32 0.0, %v810_v51 }
 0x157   : > { %2879 = vrcp.f32 %v1665_v26  ;;  %v1664_v32 = vadd.f32 1.0, %v2854_v28  ;;  %v2577_v41 = vpop.f32.mrf.mxu0  ;;  %v500_v4 = vadd.f32 %v3820_v16, %v499_v31  ;;  %v1099_v8 = vsub.f32 0.0, %v505_v55 }
 0x158   : > { %v2856_v34 = vpop.eup %2855  ;;  %2881 = vrcp.f32 %v1600_v29  ;;  %v2673_v52 = vpop.f32.mrf.mxu1  ;;  %v820_v9 = vadd.f32 %v3820_v16, %v819_v38  ;;  %v1163_v13 = vsub.f32 0.0, %v825_v60  ;;  %v515_v14 = vadd.f32 %v2577_v41, %v3820_v16 }
 0x159   : > { %v2858_v36 = vpop.eup %2857  ;;  %2883 = vrcp.f32 %v1664_v32  ;;  %v1603_v37 = vadd.f32 1.0, %v2856_v34  ;;  %v509_v56 = vpop.f32.mrf.mxu0  ;;  %v2250_v17 = vmul.f32 -1.442695, %v1096_v0  ;;  %v835_v18 = vadd.f32 %v2673_v52, %v3820_v16 }
 0x15a   : > { %v2860_v39 = vpop.eup %2859  ;;  %v1667_v40 = vadd.f32 1.0, %v2858_v36  ;;  %2885 = vpow2.f32 %v2312_v30  ;;  %v829_v5 = vpop.f32.mrf.mxu1  ;;  %v2314_v20 = vmul.f32 -1.442695, %v1160_v3  ;;  %v1098_v21 = vsub.f32 0.0, %v500_v4 }
 0x15b   : > { %v2862_v42 = vpop.eup %2861  ;;  %2887 = vrcp.f32 %v1603_v37  ;;  %v1602_v43 = vadd.f32 1.0, %v2860_v39  ;;  %v2580_v10 = vpop.f32.mrf.mxu0  ;;  %v510_v22 = vadd.f32 %v3820_v16, %v509_v56  ;;  %v2253_v25 = vmul.f32 -1.442695, %v1099_v8 }
 0x15c   : > { %v2864_v45 = vpop.eup %2863  ;;  %2889 = vrcp.f32 %v1667_v40  ;;  %v1666_v46 = vadd.f32 1.0, %v2862_v42  ;;  %v2676_v23 = vpop.f32.mrf.mxu1  ;;  %v1162_v26 = vsub.f32 0.0, %v820_v9  ;;  %v830_v27 = vadd.f32 %v3820_v16, %v829_v5 }
 0x15d   : > { %v2866_v49 = vpop.eup %2865  ;;  %2891 = vrcp.f32 %v1602_v43  ;;  %v1605_v50 = vadd.f32 1.0, %v2864_v45  ;;  %v519_v28 = vpop.f32.mrf.mxu0  ;;  %v2317_v30 = vmul.f32 -1.442695, %v1163_v13  ;;  %v1101_v31 = vsub.f32 0.0, %v515_v14 }
 0x15e   : > { %v2868_v53 = vpop.eup %2867  ;;  %2893 = vrcp.f32 %v1666_v46  ;;  %v1669_v54 = vadd.f32 1.0, %v2866_v49  ;;  %v525_v32 = vadd.f32 %v2580_v10, %v3820_v16  ;;  %v1165_v35 = vsub.f32 0.0, %v835_v18  ;;  %v839_v41 = vpop.f32.mrf.mxu1 }
 0x15f   : > { %v2870_v57 = vpop.eup %2869  ;;  %2895 = vrcp.f32 %v1605_v50  ;;  %v1604_v58 = vadd.f32 1.0, %v2868_v53  ;;  %v845_v36 = vadd.f32 %v2676_v23, %v3820_v16  ;;  %v2252_v38 = vmul.f32 -1.442695, %v1098_v21  ;;  %v2583_v45 = vpop.f32.mrf.mxu0 }
 0x160   : > { %v2872_v61 = vpop.eup %2871  ;;  %2897 = vrcp.f32 %v1669_v54  ;;  %v1668_v62 = vadd.f32 1.0, %v2870_v57  ;;  %v1100_v39 = vsub.f32 0.0, %v510_v22  ;;  %v520_v40 = vadd.f32 %v3820_v16, %v519_v28  ;;  %v2679_v55 = vpop.f32.mrf.mxu1 }
 0x161   : > { %v2874_v1 = vpop.eup %2873  ;;  %2899 = vrcp.f32 %v1604_v58  ;;  %v1607_v2 = vadd.f32 1.0, %v2872_v61  ;;  %v2316_v43 = vmul.f32 -1.442695, %v1162_v26  ;;  %v1164_v44 = vsub.f32 0.0, %v830_v27 }
 0x162   : > { %v2876_v6 = vpop.eup %2875  ;;  %2901 = vrcp.f32 %v1668_v62  ;;  %v1671_v7 = vadd.f32 1.0, %v2874_v1  ;;  %v2255_v47 = vmul.f32 -1.442695, %v1101_v31  ;;  %v1103_v48 = vsub.f32 0.0, %v525_v32 }
 0x163   : > { %v2878_v11 = vpop.eup %2877  ;;  %2903 = vrcp.f32 %v1607_v2  ;;  %v1606_v12 = vadd.f32 1.0, %v2876_v6  ;;  %v2319_v50 = vmul.f32 -1.442695, %v1165_v35  ;;  %v1167_v51 = vsub.f32 0.0, %v845_v36  ;;  %v849_v2 = vpop.f32.mrf.mxu1 }
 0x164   : > { %v2880_v15 = vpop.eup %2879  ;;  %1985 = vst [vmem:[%s3849_s23 + $0x8] sm:$0xff] %v2878_v11  ;;  %2905 = vrcp.f32 %v1671_v7  ;;  %v2254_v53 = vmul.f32 -1.442695, %v1100_v39  ;;  %v1102_v54 = vsub.f32 0.0, %v520_v40  ;;  %v2318_v57 = vmul.f32 -1.442695, %v1164_v44 }
 0x165   : > { %v2882_v19 = vpop.eup %2881  ;;  %2049 = vst [vmem:[%s3849_s23 + $0x208] sm:$0xff] %v2880_v15  ;;  %2907 = vrcp.f32 %v1606_v12  ;;  %v840_v58 = vadd.f32 %v3820_v16, %v839_v41  ;;  %v2257_v61 = vmul.f32 -1.442695, %v1103_v48  ;;  %v2682_v11 = vpop.f32.mrf.mxu1  ;;  %v855_v21 = vadd.f32 %v2679_v55, %v3820_v16 }
 0x166   : > { %v2884_v24 = vpop.eup %2883  ;;  %1984 = vst [vmem:[%s3849_s23] sm:$0xff] %v2882_v19  ;;  %2909 = vpow2.f32 %v2251_v59  ;;  %v529_v59 = vpop.f32.mrf.mxu0  ;;  %v2256_v1 = vmul.f32 -1.442695, %v1102_v54  ;;  %v535_v19 = vadd.f32 %v2583_v45, %v3820_v16 }
 0x167   : > { %v2886_v29 = vpop.eup %2885  ;;  %2048 = vst [vmem:[%s3849_s23 + $0x200] sm:$0xff] %v2884_v24  ;;  %2911 = vpow2.f32 %v2315_v63  ;;  %v2321_v63 = vmul.f32 -1.442695, %v1167_v51  ;;  %v1166_v4 = vsub.f32 0.0, %v840_v58  ;;  %v859_v24 = vpop.f32.mrf.mxu1 }
 0x168   : > { %v2888_v33 = vpop.eup %2887  ;;  %v1670_v34 = vadd.f32 1.0, %v2886_v29  ;;  %2913 = vpow2.f32 %v2250_v17  ;;  %v2586_v5 = vpop.f32.mrf.mxu0 }
 0x169   : > { %v2890_v37 = vpop.eup %2889  ;;  %1987 = vst [vmem:[%s3849_s23 + $0x18] sm:$0xff] %v2888_v33  ;;  %2915 = vpow2.f32 %v2314_v20  ;;  %v2320_v14 = vmul.f32 -1.442695, %v1166_v4  ;;  %v1169_v33 = vsub.f32 0.0, %v855_v21  ;;  %v545_v41 = vadd.f32 %v2586_v5, %v3820_v16 }
 0x16a   : > { %v2892_v42 = vpop.eup %2891  ;;  %2051 = vst [vmem:[%s3849_s23 + $0x218] sm:$0xff] %v2890_v37  ;;  %2917 = vrcp.f32 %v1670_v34  ;;  %v539_v15 = vpop.f32.mrf.mxu0  ;;  %v530_v34 = vadd.f32 %v3820_v16, %v529_v59  ;;  %v850_v37 = vadd.f32 %v3820_v16, %v849_v2  ;;  %v860_v59 = vadd.f32 %v3820_v16, %v859_v24 }
 0x16b   : > { %v2894_v46 = vpop.eup %2893  ;;  %1986 = vst [vmem:[%s3849_s23 + $0x10] sm:$0xff] %v2892_v42  ;;  %2919 = vpow2.f32 %v2253_v25  ;;  %v540_v54 = vadd.f32 %v3820_v16, %v539_v15  ;;  %v1107_v58 = vsub.f32 0.0, %v545_v41 }
 0x16c   : > { %v2896_v49 = vpop.eup %2895  ;;  %2050 = vst [vmem:[%s3849_s23 + $0x210] sm:$0xff] %v2894_v46  ;;  %2921 = vpow2.f32 %v2317_v30  ;;  %v2589_v27 = vpop.f32.mrf.mxu0  ;;  %v1105_v30 = vsub.f32 0.0, %v535_v19  ;;  %v865_v46 = vadd.f32 %v2682_v11, %v3820_v16  ;;  %v1170_v11 = vsub.f32 0.0, %v860_v59 }
 0x16d   : > { %v2898_v52 = vpop.eup %2897  ;;  %1989 = vst [vmem:[%s3849_s23 + $0x28] sm:$0xff] %v2896_v49  ;;  %2923 = vpow2.f32 %v2252_v38  ;;  %v2685_v38 = vpop.f32.mrf.mxu1  ;;  %v2323_v49 = vmul.f32 -1.442695, %v1169_v33 }
 0x16e   : > { %v2900_v56 = vpop.eup %2899  ;;  %2053 = vst [vmem:[%s3849_s23 + $0x228] sm:$0xff] %v2898_v52  ;;  %2925 = vpow2.f32 %v2316_v43  ;;  %v549_v42 = vpop.f32.mrf.mxu0  ;;  %v2259_v45 = vmul.f32 -1.442695, %v1105_v30 }
 0x16f   : > { %v2902_v60 = vpop.eup %2901  ;;  %1988 = vst [vmem:[%s3849_s23 + $0x20] sm:$0xff] %v2900_v56  ;;  %2927 = vpow2.f32 %v2255_v47  ;;  %v869_v55 = vpop.f32.mrf.mxu1 }
 0x170   : > { %v2904_v62 = vpop.eup %2903  ;;  %2052 = vst [vmem:[%s3849_s23 + $0x220] sm:$0xff] %v2902_v60  ;;  %2929 = vpow2.f32 %v2319_v50  ;;  %v1104_v50 = vsub.f32 0.0, %v530_v34  ;;  %v2592_v60 = vpop.f32.mrf.mxu0 }
 0x171   : > { %v2906_v0 = vpop.eup %2905  ;;  %1991 = vst [vmem:[%s3849_s23 + $0x38] sm:$0xff] %v2904_v62  ;;  %2931 = vpow2.f32 %v2254_v53  ;;  %v1168_v53 = vsub.f32 0.0, %v850_v37 }
 0x172   : > { %v2908_v3 = vpop.eup %2907  ;;  %2055 = vst [vmem:[%s3849_s23 + $0x238] sm:$0xff] %v2906_v0  ;;  %2933 = vpow2.f32 %v2318_v57  ;;  %v555_v0 = vadd.f32 %v2589_v27, %v3820_v16  ;;  %v2258_v2 = vmul.f32 -1.442695, %v1104_v50 }
 0x173   : > { %v2910_v6 = vpop.eup %2909  ;;  %1990 = vst [vmem:[%s3849_s23 + $0x30] sm:$0xff] %v2908_v3  ;;  %2935 = vpow2.f32 %v2257_v61  ;;  %v875_v3 = vadd.f32 %v2685_v38, %v3820_v16  ;;  %v2322_v5 = vmul.f32 -1.442695, %v1168_v53 }
 0x174   : > { %v2912_v7 = vpop.eup %2911  ;;  %v1609_v8 = vadd.f32 1.0, %v2910_v6  ;;  %2937 = vpow2.f32 %v2321_v63  ;;  %v1171_v63 = vsub.f32 0.0, %v865_v46  ;;  %v1106_v6 = vsub.f32 0.0, %v540_v54 }
 0x175   : > { %v2914_v9 = vpop.eup %2913  ;;  %v1673_v10 = vadd.f32 1.0, %v2912_v7  ;;  %2939 = vpow2.f32 %v2256_v1  ;;  %v550_v7 = vadd.f32 %v3820_v16, %v549_v42  ;;  %v1173_v21 = vsub.f32 0.0, %v875_v3 }
 0x176   : > { %v2916_v12 = vpop.eup %2915  ;;  %2941 = vrcp.f32 %v1609_v8  ;;  %v1608_v13 = vadd.f32 1.0, %v2914_v9  ;;  %v2688_v8 = vpop.f32.mrf.mxu1  ;;  %v2325_v15 = vmul.f32 -1.442695, %v1171_v63  ;;  %v2260_v24 = vmul.f32 -1.442695, %v1106_v6 }
 0x177   : > { %v2918_v17 = vpop.eup %2917  ;;  %2943 = vrcp.f32 %v1673_v10  ;;  %v1672_v18 = vadd.f32 1.0, %v2916_v12  ;;  %v2261_v10 = vmul.f32 -1.442695, %v1107_v58  ;;  %v870_v12 = vadd.f32 %v3820_v16, %v869_v55 }
 0x178   : > { %v2920_v20 = vpop.eup %2919  ;;  %2054 = vst [vmem:[%s3849_s23 + $0x230] sm:$0xff] %v2918_v17  ;;  %2945 = vrcp.f32 %v1608_v13  ;;  %v559_v13 = vpop.f32.mrf.mxu0  ;;  %v1109_v17 = vsub.f32 0.0, %v555_v0 }
 0x179   : > { %v2922_v22 = vpop.eup %2921  ;;  %2947 = vrcp.f32 %v1672_v18  ;;  %v1611_v23 = vadd.f32 1.0, %v2920_v20  ;;  %v565_v18 = vadd.f32 %v2592_v60, %v3820_v16  ;;  %v879_v27 = vpop.f32.mrf.mxu1  ;;  %v1172_v30 = vsub.f32 0.0, %v870_v12 }
 0x17a   : > { %v2924_v25 = vpop.eup %2923  ;;  %v1675_v26 = vadd.f32 1.0, %v2922_v22  ;;  %2949 = vpow2.f32 %v2320_v14  ;;  %v885_v22 = vadd.f32 %v2688_v8, %v3820_v16  ;;  %v2263_v33 = vmul.f32 -1.442695, %v1109_v17 }
 0x17b   : > { %v2926_v28 = vpop.eup %2925  ;;  %2951 = vrcp.f32 %v1611_v23  ;;  %v1610_v29 = vadd.f32 1.0, %v2924_v25  ;;  %v1108_v25 = vsub.f32 0.0, %v550_v7  ;;  %v1111_v34 = vsub.f32 0.0, %v565_v18  ;;  %v2691_v41 = vpop.f32.mrf.mxu1 }
 0x17c   : > { %v2928_v31 = vpop.eup %2927  ;;  %2953 = vrcp.f32 %v1675_v26  ;;  %v1674_v32 = vadd.f32 1.0, %v2926_v28  ;;  %v560_v26 = vadd.f32 %v3820_v16, %v559_v13  ;;  %v1175_v37 = vsub.f32 0.0, %v885_v22 }
 0x17d   : > { %v2930_v35 = vpop.eup %2929  ;;  %2955 = vrcp.f32 %v1610_v29  ;;  %v1613_v36 = vadd.f32 1.0, %v2928_v31  ;;  %v2324_v29 = vmul.f32 -1.442695, %v1170_v11  ;;  %v2595_v31 = vpop.f32.mrf.mxu0  ;;  %v895_v6 = vadd.f32 %v2691_v41, %v3820_v16 }
 0x17e   : > { %v2932_v39 = vpop.eup %2931  ;;  %2957 = vrcp.f32 %v1674_v32  ;;  %v1677_v40 = vadd.f32 1.0, %v2930_v35 }
 0x17f   : > { %v2934_v43 = vpop.eup %2933  ;;  %2959 = vrcp.f32 %v1613_v36  ;;  %v1612_v44 = vadd.f32 1.0, %v2932_v39  ;;  %v2327_v36 = vmul.f32 -1.442695, %v1173_v21  ;;  %v2262_v39 = vmul.f32 -1.442695, %v1108_v25 }
 0x180   : > { %v2936_v47 = vpop.eup %2935  ;;  %2961 = vrcp.f32 %v1677_v40  ;;  %v1676_v48 = vadd.f32 1.0, %v2934_v43  ;;  %v1110_v40 = vsub.f32 0.0, %v560_v26  ;;  %v2326_v43 = vmul.f32 -1.442695, %v1172_v30 }
 0x181   : > { %v2938_v51 = vpop.eup %2937  ;;  %2963 = vrcp.f32 %v1612_v44  ;;  %v1615_v52 = vadd.f32 1.0, %v2936_v47  ;;  %v880_v44 = vadd.f32 %v3820_v16, %v879_v27  ;;  %v2265_v47 = vmul.f32 -1.442695, %v1111_v34 }
 0x182   : > { %v2940_v56 = vpop.eup %2939  ;;  %2965 = vrcp.f32 %v1676_v48  ;;  %v1679_v57 = vadd.f32 1.0, %v2938_v51  ;;  %v2264_v51 = vmul.f32 -1.442695, %v1110_v40 }
 0x183   : > { %v2942_v61 = vpop.eup %2941  ;;  %2967 = vrcp.f32 %v1615_v52  ;;  %v1614_v62 = vadd.f32 1.0, %v2940_v56  ;;  %v889_v52 = vpop.f32.mrf.mxu1  ;;  %v1174_v54 = vsub.f32 0.0, %v880_v44 }
 0x184   : > { %v2944_v1 = vpop.eup %2943  ;;  %1993 = vst [vmem:[%s3849_s23 + $0x48] sm:$0xff] %v2942_v61  ;;  %2969 = vrcp.f32 %v1679_v57 }
 0x185   : > { %v2946_v4 = vpop.eup %2945  ;;  %2057 = vst [vmem:[%s3849_s23 + $0x248] sm:$0xff] %v2944_v1  ;;  %2971 = vrcp.f32 %v1614_v62  ;;  %v2694_v61 = vpop.f32.mrf.mxu1  ;;  %v2328_v0 = vmul.f32 -1.442695, %v1174_v54 }
 0x186   : > { %v2948_v9 = vpop.eup %2947  ;;  %1992 = vst [vmem:[%s3849_s23 + $0x40] sm:$0xff] %v2946_v4  ;;  %2973 = vpow2.f32 %v2259_v45  ;;  %v569_v45 = vpop.f32.mrf.mxu0 }
 0x187   : > { %v2950_v14 = vpop.eup %2949  ;;  %2056 = vst [vmem:[%s3849_s23 + $0x240] sm:$0xff] %v2948_v9  ;;  %2975 = vpow2.f32 %v2323_v49  ;;  %v2329_v49 = vmul.f32 -1.442695, %v1175_v37  ;;  %v899_v9 = vpop.f32.mrf.mxu1 }
 0x188   : > { %v2952_v19 = vpop.eup %2951  ;;  %v1678_v20 = vadd.f32 1.0, %v2950_v14  ;;  %2977 = vpow2.f32 %v2258_v2  ;;  %v2598_v55 = vpop.f32.mrf.mxu0 }
 0x189   : > { %v2954_v23 = vpop.eup %2953  ;;  %1995 = vst [vmem:[%s3849_s23 + $0x58] sm:$0xff] %v2952_v19  ;;  %2979 = vpow2.f32 %v2322_v5  ;;  %v575_v5 = vadd.f32 %v2595_v31, %v3820_v16  ;;  %v585_v27 = vadd.f32 %v2598_v55, %v3820_v16 }
 0x18a   : > { %v2956_v28 = vpop.eup %2955  ;;  %2059 = vst [vmem:[%s3849_s23 + $0x258] sm:$0xff] %v2954_v23  ;;  %2981 = vrcp.f32 %v1678_v20  ;;  %v579_v1 = vpop.f32.mrf.mxu0  ;;  %v1177_v20 = vsub.f32 0.0, %v895_v6  ;;  %v890_v23 = vadd.f32 %v3820_v16, %v889_v52 }
 0x18b   : > { %v2958_v32 = vpop.eup %2957  ;;  %1994 = vst [vmem:[%s3849_s23 + $0x50] sm:$0xff] %v2956_v28  ;;  %2983 = vpow2.f32 %v2261_v10  ;;  %v1113_v19 = vsub.f32 0.0, %v575_v5  ;;  %v580_v40 = vadd.f32 %v3820_v16, %v579_v1  ;;  %v1115_v44 = vsub.f32 0.0, %v585_v27 }
 0x18c   : > { %v2960_v35 = vpop.eup %2959  ;;  %2058 = vst [vmem:[%s3849_s23 + $0x250] sm:$0xff] %v2958_v32  ;;  %2985 = vpow2.f32 %v2325_v15  ;;  %v2601_v12 = vpop.f32.mrf.mxu0  ;;  %v570_v15 = vadd.f32 %v3820_v16, %v569_v45  ;;  %v905_v32 = vadd.f32 %v2694_v61, %v3820_v16  ;;  %v900_v45 = vadd.f32 %v3820_v16, %v899_v9 }
 0x18d   : > { %v2962_v38 = vpop.eup %2961  ;;  %1997 = vst [vmem:[%s3849_s23 + $0x68] sm:$0xff] %v2960_v35  ;;  %2987 = vpow2.f32 %v2260_v24  ;;  %v2697_v24 = vpop.f32.mrf.mxu1  ;;  %v2267_v35 = vmul.f32 -1.442695, %v1113_v19 }
 0x18e   : > { %v2964_v42 = vpop.eup %2963  ;;  %2061 = vst [vmem:[%s3849_s23 + $0x268] sm:$0xff] %v2962_v38  ;;  %2989 = vpow2.f32 %v2324_v29  ;;  %v589_v28 = vpop.f32.mrf.mxu0  ;;  %v1112_v31 = vsub.f32 0.0, %v570_v15  ;;  %v1178_v61 = vsub.f32 0.0, %v900_v45 }
 0x18f   : > { %v2966_v46 = vpop.eup %2965  ;;  %1996 = vst [vmem:[%s3849_s23 + $0x60] sm:$0xff] %v2964_v42  ;;  %2991 = vpow2.f32 %v2263_v33  ;;  %v909_v41 = vpop.f32.mrf.mxu1 }
 0x190   : > { %v2968_v48 = vpop.eup %2967  ;;  %2060 = vst [vmem:[%s3849_s23 + $0x260] sm:$0xff] %v2966_v46  ;;  %2993 = vpow2.f32 %v2327_v36  ;;  %v2331_v36 = vmul.f32 -1.442695, %v1177_v20  ;;  %v2604_v46 = vpop.f32.mrf.mxu0  ;;  %v2266_v52 = vmul.f32 -1.442695, %v1112_v31 }
 0x191   : > { %v2970_v50 = vpop.eup %2969  ;;  %1999 = vst [vmem:[%s3849_s23 + $0x78] sm:$0xff] %v2968_v48  ;;  %2995 = vpow2.f32 %v2262_v39  ;;  %v1176_v39 = vsub.f32 0.0, %v890_v23 }
 0x192   : > { %v2972_v53 = vpop.eup %2971  ;;  %2063 = vst [vmem:[%s3849_s23 + $0x278] sm:$0xff] %v2970_v50  ;;  %2997 = vpow2.f32 %v2326_v43  ;;  %v595_v50 = vadd.f32 %v2601_v12, %v3820_v16 }
 0x193   : > { %v2974_v56 = vpop.eup %2973  ;;  %1998 = vst [vmem:[%s3849_s23 + $0x70] sm:$0xff] %v2972_v53  ;;  %2999 = vpow2.f32 %v2265_v47  ;;  %v915_v53 = vadd.f32 %v2697_v24, %v3820_v16  ;;  %v2330_v55 = vmul.f32 -1.442695, %v1176_v39 }
 0x194   : > { %v2976_v57 = vpop.eup %2975  ;;  %v1617_v58 = vadd.f32 1.0, %v2974_v56  ;;  %3001 = vpow2.f32 %v2329_v49  ;;  %v1179_v49 = vsub.f32 0.0, %v905_v32  ;;  %v1114_v56 = vsub.f32 0.0, %v580_v40 }
 0x195   : > { %v2978_v59 = vpop.eup %2977  ;;  %v1681_v60 = vadd.f32 1.0, %v2976_v57  ;;  %3003 = vpow2.f32 %v2264_v51  ;;  %v590_v57 = vadd.f32 %v3820_v16, %v589_v28  ;;  %v1181_v6 = vsub.f32 0.0, %v915_v53 }
 0x196   : > { %v2980_v62 = vpop.eup %2979  ;;  %3005 = vrcp.f32 %v1617_v58  ;;  %v1616_v63 = vadd.f32 1.0, %v2978_v59  ;;  %v2700_v58 = vpop.f32.mrf.mxu1  ;;  %v2333_v1 = vmul.f32 -1.442695, %v1179_v49  ;;  %v2268_v9 = vmul.f32 -1.442695, %v1114_v56 }
 0x197   : > { %v2982_v2 = vpop.eup %2981  ;;  %3007 = vrcp.f32 %v1681_v60  ;;  %v1680_v3 = vadd.f32 1.0, %v2980_v62  ;;  %v2269_v60 = vmul.f32 -1.442695, %v1115_v44  ;;  %v910_v62 = vadd.f32 %v3820_v16, %v909_v41 }
 0x198   : > { %v2984_v4 = vpop.eup %2983  ;;  %2062 = vst [vmem:[%s3849_s23 + $0x270] sm:$0xff] %v2982_v2  ;;  %3009 = vrcp.f32 %v1616_v63  ;;  %v599_v63 = vpop.f32.mrf.mxu0  ;;  %v1117_v2 = vsub.f32 0.0, %v595_v50 }
 0x199   : > { %v2986_v7 = vpop.eup %2985  ;;  %3011 = vrcp.f32 %v1680_v3  ;;  %v1619_v8 = vadd.f32 1.0, %v2984_v4  ;;  %v605_v3 = vadd.f32 %v2604_v46, %v3820_v16  ;;  %v919_v12 = vpop.f32.mrf.mxu1  ;;  %v1180_v15 = vsub.f32 0.0, %v910_v62 }
 0x19a   : > { %v2988_v10 = vpop.eup %2987  ;;  %v1683_v11 = vadd.f32 1.0, %v2986_v7  ;;  %3013 = vpow2.f32 %v2328_v0  ;;  %v925_v7 = vadd.f32 %v2700_v58, %v3820_v16  ;;  %v2271_v19 = vmul.f32 -1.442695, %v1117_v2 }
 0x19b   : > { %v2990_v13 = vpop.eup %2989  ;;  %3015 = vrcp.f32 %v1619_v8  ;;  %v1618_v14 = vadd.f32 1.0, %v2988_v10  ;;  %v1116_v10 = vsub.f32 0.0, %v590_v57  ;;  %v1119_v20 = vsub.f32 0.0, %v605_v3 }
 0x19c   : > { %v2992_v17 = vpop.eup %2991  ;;  %3017 = vrcp.f32 %v1683_v11  ;;  %v1682_v18 = vadd.f32 1.0, %v2990_v13  ;;  %v600_v11 = vadd.f32 %v3820_v16, %v599_v63  ;;  %v1183_v16 = vsub.f32 0.0, %v925_v7 }
 0x19d   : > { %v2994_v21 = vpop.eup %2993  ;;  %3019 = vrcp.f32 %v1618_v14  ;;  %v1621_v22 = vadd.f32 1.0, %v2992_v17  ;;  %v2332_v14 = vmul.f32 -1.442695, %v1178_v61  ;;  %v3927_v17 = vpop.f32.mrf.mxu0  ;;  %v2270_v24 = vmul.f32 -1.442695, %v1116_v10 }
 0x19e   : > { %v2996_v25 = vpop.eup %2995  ;;  %3021 = vrcp.f32 %v1682_v18  ;;  %v1685_v26 = vadd.f32 1.0, %v2994_v21  ;;  %v2334_v28 = vmul.f32 -1.442695, %v1180_v15 }
 0x19f   : > { %v2998_v29 = vpop.eup %2997  ;;  %3023 = vrcp.f32 %v1621_v22  ;;  %v1620_v30 = vadd.f32 1.0, %v2996_v25  ;;  %v2335_v22 = vmul.f32 -1.442695, %v1181_v6  ;;  %v1118_v25 = vsub.f32 0.0, %v600_v11  ;;  %v609_v31 = vpop.f32.mrf.mxu0 }
 0x1a0   : > { %v3000_v33 = vpop.eup %2999  ;;  %3025 = vrcp.f32 %v1685_v26  ;;  %v1684_v34 = vadd.f32 1.0, %v2998_v29  ;;  %v2703_v26 = vpop.f32.mrf.mxu1  ;;  %v3933_v29 = vld [vmem:[#allocation7] ss:$0 sm:$0xff] }
 0x1a1   : > { %v3002_v37 = vpop.eup %3001  ;;  %3027 = vrcp.f32 %v1620_v30  ;;  %v1623_v38 = vadd.f32 1.0, %v3000_v33  ;;  %v920_v30 = vadd.f32 %v3933_v29, %v919_v12  ;;  %v2273_v33 = vmul.f32 -1.442695, %v1119_v20  ;;  %v2610_v41 = vpop.f32.mrf.mxu0 }
 0x1a2   : > { %v3004_v42 = vpop.eup %3003  ;;  %3029 = vrcp.f32 %v1684_v34  ;;  %v1687_v43 = vadd.f32 1.0, %v3002_v37  ;;  %v2272_v37 = vmul.f32 -1.442695, %v1118_v25  ;;  %v935_v56 = vadd.f32 %v3933_v29, %v2703_v26 }
 0x1a3   : > { %v3006_v47 = vpop.eup %3005  ;;  %3031 = vrcp.f32 %v1623_v38  ;;  %v1622_v48 = vadd.f32 1.0, %v3004_v42  ;;  %v929_v38 = vpop.f32.mrf.mxu1  ;;  %v1182_v40 = vsub.f32 0.0, %v920_v30  ;;  %v610_v62 = vadd.f32 %v3933_v29, %v609_v31 }
 0x1a4   : > { %v3008_v51 = vpop.eup %3007  ;;  %2001 = vst [vmem:[%s3849_s23 + $0x88] sm:$0xff] %v3006_v47  ;;  %3033 = vrcp.f32 %v1687_v43 }
 0x1a5   : > { %v3010_v54 = vpop.eup %3009  ;;  %2065 = vst [vmem:[%s3849_s23 + $0x288] sm:$0xff] %v3008_v51  ;;  %3035 = vrcp.f32 %v1622_v48  ;;  %v2706_v47 = vpop.f32.mrf.mxu1  ;;  %v2336_v50 = vmul.f32 -1.442695, %v1182_v40  ;;  %v1120_v12 = vsub.f32 0.0, %v610_v62 }
 0x1a6   : > { %v3012_v59 = vpop.eup %3011  ;;  %2000 = vst [vmem:[%s3849_s23 + $0x80] sm:$0xff] %v3010_v54  ;;  %3037 = vpow2.f32 %v2267_v35  ;;  %v2337_v35 = vmul.f32 -1.442695, %v1183_v16  ;;  %v619_v51 = vpop.f32.mrf.mxu0 }
 0x1a7   : > { %v3014_v0 = vpop.eup %3013  ;;  %2064 = vst [vmem:[%s3849_s23 + $0x280] sm:$0xff] %v3012_v59  ;;  %3039 = vpow2.f32 %v2331_v36  ;;  %v939_v59 = vpop.f32.mrf.mxu1  ;;  %v620_v25 = vadd.f32 %v3933_v29, %v619_v51 }
 0x1a8   : > { %v3016_v4 = vpop.eup %3015  ;;  %v1686_v5 = vadd.f32 1.0, %v3014_v0  ;;  %3041 = vpow2.f32 %v2266_v52  ;;  %v2613_v63 = vpop.f32.mrf.mxu0  ;;  %v940_v30 = vadd.f32 %v3933_v29, %v939_v59 }
 0x1a9   : > { %v3018_v8 = vpop.eup %3017  ;;  %2003 = vst [vmem:[%s3849_s23 + $0x98] sm:$0xff] %v3016_v4  ;;  %3043 = vpow2.f32 %v2330_v55  ;;  %v615_v55 = vadd.f32 %v3933_v29, %v3927_v17  ;;  %v625_v17 = vadd.f32 %v3933_v29, %v2610_v41  ;;  %v635_v31 = vadd.f32 %v3933_v29, %v2613_v63 }
 0x1aa   : > { %v3020_v13 = vpop.eup %3019  ;;  %2067 = vst [vmem:[%s3849_s23 + $0x298] sm:$0xff] %v3018_v8  ;;  %3045 = vrcp.f32 %v1686_v5  ;;  %v1185_v5 = vsub.f32 0.0, %v935_v56  ;;  %v930_v8 = vadd.f32 %v3933_v29, %v929_v38  ;;  %v2274_v38 = vmul.f32 -1.442695, %v1120_v12 }
 0x1ab   : > { %v3022_v18 = vpop.eup %3021  ;;  %2002 = vst [vmem:[%s3849_s23 + $0x90] sm:$0xff] %v3020_v13  ;;  %3047 = vpow2.f32 %v2269_v60  ;;  %v1121_v4 = vsub.f32 0.0, %v615_v55  ;;  %v629_v13 = vpop.f32.mrf.mxu0 }
 0x1ac   : > { %v3024_v21 = vpop.eup %3023  ;;  %2066 = vst [vmem:[%s3849_s23 + $0x290] sm:$0xff] %v3022_v18  ;;  %3049 = vpow2.f32 %v2333_v1  ;;  %v945_v18 = vadd.f32 %v3933_v29, %v2706_v47  ;;  %v1125_v47 = vsub.f32 0.0, %v635_v31 }
 0x1ad   : > { %v3026_v23 = vpop.eup %3025  ;;  %2005 = vst [vmem:[%s3849_s23 + $0xa8] sm:$0xff] %v3024_v21  ;;  %3051 = vpow2.f32 %v2268_v9  ;;  %v2709_v9 = vpop.f32.mrf.mxu1  ;;  %v2275_v21 = vmul.f32 -1.442695, %v1121_v4 }
 0x1ae   : > { %v3028_v27 = vpop.eup %3027  ;;  %2069 = vst [vmem:[%s3849_s23 + $0x2a8] sm:$0xff] %v3026_v23  ;;  %3053 = vpow2.f32 %v2332_v14  ;;  %v2279_v4 = vmul.f32 -1.442695, %v1125_v47 }
 0x1af   : > { %v3030_v32 = vpop.eup %3029  ;;  %2004 = vst [vmem:[%s3849_s23 + $0xa0] sm:$0xff] %v3028_v27  ;;  %3055 = vpow2.f32 %v2271_v19  ;;  %v949_v26 = vpop.f32.mrf.mxu1 }
 0x1b0   : > { %v3032_v34 = vpop.eup %3031  ;;  %2068 = vst [vmem:[%s3849_s23 + $0x2a0] sm:$0xff] %v3030_v32  ;;  %3057 = vpow2.f32 %v2335_v22  ;;  %v2339_v22 = vmul.f32 -1.442695, %v1185_v5  ;;  %v2616_v32 = vpop.f32.mrf.mxu0 }
 0x1b1   : > { %v3034_v36 = vpop.eup %3033  ;;  %2007 = vst [vmem:[%s3849_s23 + $0xb8] sm:$0xff] %v3032_v34  ;;  %3059 = vpow2.f32 %v2270_v24  ;;  %v1184_v24 = vsub.f32 0.0, %v930_v8 }
 0x1b2   : > { %v3036_v39 = vpop.eup %3035  ;;  %2071 = vst [vmem:[%s3849_s23 + $0x2b8] sm:$0xff] %v3034_v36  ;;  %3061 = vpow2.f32 %v2334_v28  ;;  %v1187_v36 = vsub.f32 0.0, %v945_v18 }
 0x1b3   : > { %v3038_v42 = vpop.eup %3037  ;;  %2006 = vst [vmem:[%s3849_s23 + $0xb0] sm:$0xff] %v3036_v39  ;;  %3063 = vpow2.f32 %v2273_v33  ;;  %v955_v39 = vadd.f32 %v3933_v29, %v2709_v9  ;;  %v2338_v41 = vmul.f32 -1.442695, %v1184_v24 }
 0x1b4   : > { %v3040_v43 = vpop.eup %3039  ;;  %v1625_v44 = vadd.f32 1.0, %v3038_v42  ;;  %3065 = vpow2.f32 %v2337_v35  ;;  %v1123_v35 = vsub.f32 0.0, %v625_v17  ;;  %v1122_v42 = vsub.f32 0.0, %v620_v25 }
 0x1b5   : > { %v3042_v45 = vpop.eup %3041  ;;  %v1689_v46 = vadd.f32 1.0, %v3040_v43  ;;  %3067 = vpow2.f32 %v2272_v37  ;;  %v630_v43 = vadd.f32 %v3933_v29, %v629_v13  ;;  %v1189_v56 = vsub.f32 0.0, %v955_v39 }
 0x1b6   : > { %v3044_v48 = vpop.eup %3043  ;;  %3069 = vrcp.f32 %v1625_v44  ;;  %v1624_v49 = vadd.f32 1.0, %v3042_v45  ;;  %v2712_v44 = vpop.f32.mrf.mxu1  ;;  %v2277_v51 = vmul.f32 -1.442695, %v1123_v35  ;;  %v2276_v59 = vmul.f32 -1.442695, %v1122_v42 }
 0x1b7   : > { %v3046_v52 = vpop.eup %3045  ;;  %3071 = vrcp.f32 %v1689_v46  ;;  %v1688_v53 = vadd.f32 1.0, %v3044_v48  ;;  %v1186_v46 = vsub.f32 0.0, %v940_v30  ;;  %v950_v48 = vadd.f32 %v3933_v29, %v949_v26 }
 0x1b8   : > { %v3048_v54 = vpop.eup %3047  ;;  %2070 = vst [vmem:[%s3849_s23 + $0x2b0] sm:$0xff] %v3046_v52  ;;  %3073 = vrcp.f32 %v1624_v49  ;;  %v639_v49 = vpop.f32.mrf.mxu0  ;;  %v2341_v52 = vmul.f32 -1.442695, %v1187_v36 }
 0x1b9   : > { %v3050_v57 = vpop.eup %3049  ;;  %3075 = vrcp.f32 %v1688_v53  ;;  %v1627_v58 = vadd.f32 1.0, %v3048_v54  ;;  %v645_v53 = vadd.f32 %v3933_v29, %v2616_v32  ;;  %v959_v62 = vpop.f32.mrf.mxu1 }
 0x1ba   : > { %v3052_v60 = vpop.eup %3051  ;;  %v1691_v61 = vadd.f32 1.0, %v3050_v57  ;;  %3077 = vpow2.f32 %v2336_v50  ;;  %v965_v57 = vadd.f32 %v3933_v29, %v2712_v44 }
 0x1bb   : > { %v3054_v0 = vpop.eup %3053  ;;  %3079 = vrcp.f32 %v1627_v58  ;;  %v1626_v1 = vadd.f32 1.0, %v3052_v60  ;;  %v1124_v60 = vsub.f32 0.0, %v630_v43  ;;  %v1127_v5 = vsub.f32 0.0, %v645_v53  ;;  %v2715_v12 = vpop.f32.mrf.mxu1 }
 0x1bc   : > { %v3056_v2 = vpop.eup %3055  ;;  %3081 = vrcp.f32 %v1691_v61  ;;  %v1690_v3 = vadd.f32 1.0, %v3054_v0  ;;  %v640_v61 = vadd.f32 %v3933_v29, %v639_v49  ;;  %v2340_v0 = vmul.f32 -1.442695, %v1186_v46 }
 0x1bd   : > { %v3058_v6 = vpop.eup %3057  ;;  %3083 = vrcp.f32 %v1626_v1  ;;  %v1629_v7 = vadd.f32 1.0, %v3056_v2  ;;  %v1188_v1 = vsub.f32 0.0, %v950_v48  ;;  %v2619_v2 = vpop.f32.mrf.mxu0  ;;  %v1191_v8 = vsub.f32 0.0, %v965_v57 }
 0x1be   : > { %v3060_v10 = vpop.eup %3059  ;;  %3085 = vrcp.f32 %v1690_v3  ;;  %v1693_v11 = vadd.f32 1.0, %v3058_v6  ;;  %v975_v42 = vadd.f32 %v3933_v29, %v2715_v12 }
 0x1bf   : > { %v3062_v14 = vpop.eup %3061  ;;  %3087 = vrcp.f32 %v1629_v7  ;;  %v1628_v15 = vadd.f32 1.0, %v3060_v10  ;;  %v2343_v7 = vmul.f32 -1.442695, %v1189_v56  ;;  %v2278_v10 = vmul.f32 -1.442695, %v1124_v60  ;;  %v649_v17 = vpop.f32.mrf.mxu0 }
 0x1c0   : > { %v3064_v19 = vpop.eup %3063  ;;  %3089 = vrcp.f32 %v1693_v11  ;;  %v1692_v20 = vadd.f32 1.0, %v3062_v14  ;;  %v1126_v11 = vsub.f32 0.0, %v640_v61  ;;  %v2342_v14 = vmul.f32 -1.442695, %v1188_v1 }
 0x1c1   : > { %v3066_v16 = vpop.eup %3065  ;;  %3091 = vrcp.f32 %v1628_v15  ;;  %v1631_v23 = vadd.f32 1.0, %v3064_v19  ;;  %v960_v15 = vadd.f32 %v3933_v29, %v959_v62  ;;  %v2281_v19 = vmul.f32 -1.442695, %v1127_v5  ;;  %v2622_v26 = vpop.f32.mrf.mxu0 }
 0x1c2   : > { %v3068_v27 = vpop.eup %3067  ;;  %3093 = vrcp.f32 %v1692_v20  ;;  %v1695_v28 = vadd.f32 1.0, %v3066_v16  ;;  %v2280_v16 = vmul.f32 -1.442695, %v1126_v11  ;;  %v665_v62 = vadd.f32 %v3933_v29, %v2622_v26 }
 0x1c3   : > { %v3070_v33 = vpop.eup %3069  ;;  %3095 = vrcp.f32 %v1631_v23  ;;  %v1630_v34 = vadd.f32 1.0, %v3068_v27  ;;  %v969_v23 = vpop.f32.mrf.mxu1  ;;  %v1190_v25 = vsub.f32 0.0, %v960_v15 }
 0x1c4   : > { %v3072_v37 = vpop.eup %3071  ;;  %2009 = vst [vmem:[%s3849_s23 + $0xc8] sm:$0xff] %v3070_v33  ;;  %3097 = vrcp.f32 %v1695_v28  ;;  %v1131_v15 = vsub.f32 0.0, %v665_v62 }
 0x1c5   : > { %v3074_v40 = vpop.eup %3073  ;;  %2073 = vst [vmem:[%s3849_s23 + $0x2c8] sm:$0xff] %v3072_v37  ;;  %3099 = vrcp.f32 %v1630_v34  ;;  %v2718_v33 = vpop.f32.mrf.mxu1  ;;  %v2344_v36 = vmul.f32 -1.442695, %v1190_v25 }
 0x1c6   : > { %v3076_v45 = vpop.eup %3075  ;;  %2008 = vst [vmem:[%s3849_s23 + $0xc0] sm:$0xff] %v3074_v40  ;;  %3101 = vpow2.f32 %v2275_v21  ;;  %v2345_v21 = vmul.f32 -1.442695, %v1191_v8  ;;  %v659_v37 = vpop.f32.mrf.mxu0  ;;  %v655_v40 = vadd.f32 %v3933_v29, %v2619_v2 }
 0x1c7   : > { %v3078_v50 = vpop.eup %3077  ;;  %2072 = vst [vmem:[%s3849_s23 + $0x2c0] sm:$0xff] %v3076_v45  ;;  %3103 = vpow2.f32 %v2339_v22  ;;  %v979_v45 = vpop.f32.mrf.mxu1  ;;  %v660_v11 = vadd.f32 %v3933_v29, %v659_v37 }
 0x1c8   : > { %v3080_v54 = vpop.eup %3079  ;;  %v1694_v55 = vadd.f32 1.0, %v3078_v50  ;;  %3105 = vpow2.f32 %v2274_v38  ;;  %v2625_v48 = vpop.f32.mrf.mxu0 }
 0x1c9   : > { %v3082_v58 = vpop.eup %3081  ;;  %2011 = vst [vmem:[%s3849_s23 + $0xd8] sm:$0xff] %v3080_v54  ;;  %3107 = vpow2.f32 %v2338_v41  ;;  %v1193_v54 = vsub.f32 0.0, %v975_v42 }
 0x1ca   : > { %v3084_v63 = vpop.eup %3083  ;;  %2075 = vst [vmem:[%s3849_s23 + $0x2d8] sm:$0xff] %v3082_v58  ;;  %3109 = vrcp.f32 %v1694_v55  ;;  %v650_v55 = vadd.f32 %v3933_v29, %v649_v17  ;;  %v970_v58 = vadd.f32 %v3933_v29, %v969_v23  ;;  %v980_v17 = vadd.f32 %v3933_v29, %v979_v45 }
 0x1cb   : > { %v3086_v3 = vpop.eup %3085  ;;  %2010 = vst [vmem:[%s3849_s23 + $0xd0] sm:$0xff] %v3084_v63  ;;  %3111 = vpow2.f32 %v2277_v51  ;;  %v1129_v51 = vsub.f32 0.0, %v655_v40  ;;  %v669_v63 = vpop.f32.mrf.mxu0 }
 0x1cc   : > { %v3088_v6 = vpop.eup %3087  ;;  %2074 = vst [vmem:[%s3849_s23 + $0x2d0] sm:$0xff] %v3086_v3  ;;  %3113 = vpow2.f32 %v2341_v52  ;;  %v985_v3 = vadd.f32 %v3933_v29, %v2718_v33  ;;  %v1194_v33 = vsub.f32 0.0, %v980_v17 }
 0x1cd   : > { %v3090_v9 = vpop.eup %3089  ;;  %2013 = vst [vmem:[%s3849_s23 + $0xe8] sm:$0xff] %v3088_v6  ;;  %3115 = vpow2.f32 %v2276_v59  ;;  %v2721_v59 = vpop.f32.mrf.mxu1  ;;  %v2283_v2 = vmul.f32 -1.442695, %v1129_v51  ;;  %v2347_v6 = vmul.f32 -1.442695, %v1193_v54 }
 0x1ce   : > { %v3092_v13 = vpop.eup %3091  ;;  %2077 = vst [vmem:[%s3849_s23 + $0x2e8] sm:$0xff] %v3090_v9  ;;  %3117 = vpow2.f32 %v2340_v0 }
 0x1cf   : > { %v3094_v18 = vpop.eup %3093  ;;  %2012 = vst [vmem:[%s3849_s23 + $0xe0] sm:$0xff] %v3092_v13  ;;  %3119 = vpow2.f32 %v2279_v4  ;;  %v989_v12 = vpop.f32.mrf.mxu1 }
 0x1d0   : > { %v3096_v20 = vpop.eup %3095  ;;  %2076 = vst [vmem:[%s3849_s23 + $0x2e0] sm:$0xff] %v3094_v18  ;;  %3121 = vpow2.f32 %v2343_v7  ;;  %v1128_v7 = vsub.f32 0.0, %v650_v55  ;;  %v2628_v18 = vpop.f32.mrf.mxu0 }
 0x1d1   : > { %v3098_v22 = vpop.eup %3097  ;;  %2015 = vst [vmem:[%s3849_s23 + $0xf8] sm:$0xff] %v3096_v20  ;;  %3123 = vpow2.f32 %v2278_v10  ;;  %v1192_v10 = vsub.f32 0.0, %v970_v58 }
 0x1d2   : > { %v3100_v24 = vpop.eup %3099  ;;  %2079 = vst [vmem:[%s3849_s23 + $0x2f8] sm:$0xff] %v3098_v22  ;;  %3125 = vpow2.f32 %v2342_v14  ;;  %v675_v22 = vadd.f32 %v3933_v29, %v2625_v48  ;;  %v2282_v23 = vmul.f32 -1.442695, %v1128_v7 }
 0x1d3   : > { %v3102_v27 = vpop.eup %3101  ;;  %2014 = vst [vmem:[%s3849_s23 + $0xf0] sm:$0xff] %v3100_v24  ;;  %3127 = vpow2.f32 %v2281_v19  ;;  %v995_v24 = vadd.f32 %v3933_v29, %v2721_v59  ;;  %v2346_v26 = vmul.f32 -1.442695, %v1192_v10 }
 0x1d4   : > { %v3104_v28 = vpop.eup %3103  ;;  %v1633_v30 = vadd.f32 1.0, %v3102_v27  ;;  %3129 = vpow2.f32 %v2345_v21  ;;  %v1195_v21 = vsub.f32 0.0, %v985_v3  ;;  %v1130_v27 = vsub.f32 0.0, %v660_v11 }
 0x1d5   : > { %v3106_v31 = vpop.eup %3105  ;;  %v1697_v32 = vadd.f32 1.0, %v3104_v28  ;;  %3131 = vpow2.f32 %v2280_v16  ;;  %v670_v28 = vadd.f32 %v3933_v29, %v669_v63  ;;  %v1197_v42 = vsub.f32 0.0, %v995_v24 }
 0x1d6   : > { %v3108_v34 = vpop.eup %3107  ;;  %3133 = vrcp.f32 %v1633_v30  ;;  %v1632_v35 = vadd.f32 1.0, %v3106_v31  ;;  %v2724_v30 = vpop.f32.mrf.mxu1  ;;  %v2349_v37 = vmul.f32 -1.442695, %v1195_v21  ;;  %v2284_v45 = vmul.f32 -1.442695, %v1130_v27 }
 0x1d7   : > { %v3110_v38 = vpop.eup %3109  ;;  %3135 = vrcp.f32 %v1697_v32  ;;  %v1696_v39 = vadd.f32 1.0, %v3108_v34  ;;  %v2285_v32 = vmul.f32 -1.442695, %v1131_v15  ;;  %v990_v34 = vadd.f32 %v3933_v29, %v989_v12 }
 0x1d8   : > { %v3112_v41 = vpop.eup %3111  ;;  %2078 = vst [vmem:[%s3849_s23 + $0x2f0] sm:$0xff] %v3110_v38  ;;  %3137 = vrcp.f32 %v1632_v35  ;;  %v679_v35 = vpop.f32.mrf.mxu0  ;;  %v1133_v38 = vsub.f32 0.0, %v675_v22 }
 0x1d9   : > { %v3114_v43 = vpop.eup %3113  ;;  %3139 = vrcp.f32 %v1696_v39  ;;  %v1635_v44 = vadd.f32 1.0, %v3112_v41  ;;  %v685_v39 = vadd.f32 %v3933_v29, %v2628_v18  ;;  %v999_v48 = vpop.f32.mrf.mxu1  ;;  %v1196_v51 = vsub.f32 0.0, %v990_v34 }
 0x1da   : > { %v3116_v46 = vpop.eup %3115  ;;  %v1699_v47 = vadd.f32 1.0, %v3114_v43  ;;  %3141 = vpow2.f32 %v2344_v36  ;;  %v1005_v43 = vadd.f32 %v3933_v29, %v2724_v30  ;;  %v2287_v54 = vmul.f32 -1.442695, %v1133_v38 }
 0x1db   : > { %v3118_v49 = vpop.eup %3117  ;;  %3143 = vrcp.f32 %v1635_v44  ;;  %v1634_v50 = vadd.f32 1.0, %v3116_v46  ;;  %v1132_v46 = vsub.f32 0.0, %v670_v28  ;;  %v1135_v55 = vsub.f32 0.0, %v685_v39  ;;  %v2727_v62 = vpop.f32.mrf.mxu1 }
 0x1dc   : > { %v3120_v52 = vpop.eup %3119  ;;  %3145 = vrcp.f32 %v1699_v47  ;;  %v1698_v53 = vadd.f32 1.0, %v3118_v49  ;;  %v680_v47 = vadd.f32 %v3933_v29, %v679_v35  ;;  %v1199_v58 = vsub.f32 0.0, %v1005_v43 }
 0x1dd   : > { %v3122_v56 = vpop.eup %3121  ;;  %3147 = vrcp.f32 %v1634_v50  ;;  %v1637_v57 = vadd.f32 1.0, %v3120_v52  ;;  %v2348_v50 = vmul.f32 -1.442695, %v1194_v33  ;;  %v2631_v52 = vpop.f32.mrf.mxu0  ;;  %v1015_v27 = vadd.f32 %v3933_v29, %v2727_v62 }
 0x1de   : > { %v3124_v60 = vpop.eup %3123  ;;  %3149 = vrcp.f32 %v1698_v53  ;;  %v1701_v61 = vadd.f32 1.0, %v3122_v56 }
 0x1df   : > { %v3126_v0 = vpop.eup %3125  ;;  %3151 = vrcp.f32 %v1637_v57  ;;  %v1636_v1 = vadd.f32 1.0, %v3124_v60  ;;  %v2351_v57 = vmul.f32 -1.442695, %v1197_v42  ;;  %v2286_v60 = vmul.f32 -1.442695, %v1132_v46 }
 0x1e0   : > { %v3128_v4 = vpop.eup %3127  ;;  %3153 = vrcp.f32 %v1701_v61  ;;  %v1700_v5 = vadd.f32 1.0, %v3126_v0  ;;  %v1134_v61 = vsub.f32 0.0, %v680_v47  ;;  %v2350_v0 = vmul.f32 -1.442695, %v1196_v51 }
 0x1e1   : > { %v3130_v8 = vpop.eup %3129  ;;  %3155 = vrcp.f32 %v1636_v1  ;;  %v1639_v9 = vadd.f32 1.0, %v3128_v4  ;;  %v1000_v1 = vadd.f32 %v3933_v29, %v999_v48  ;;  %v2289_v4 = vmul.f32 -1.442695, %v1135_v55 }
 0x1e2   : > { %v3132_v13 = vpop.eup %3131  ;;  %3157 = vrcp.f32 %v1700_v5  ;;  %v1703_v14 = vadd.f32 1.0, %v3130_v8  ;;  %v2288_v8 = vmul.f32 -1.442695, %v1134_v61 }
 0x1e3   : > { %v3134_v19 = vpop.eup %3133  ;;  %3159 = vrcp.f32 %v1639_v9  ;;  %v1638_v20 = vadd.f32 1.0, %v3132_v13  ;;  %v1009_v9 = vpop.f32.mrf.mxu1  ;;  %v1198_v11 = vsub.f32 0.0, %v1000_v1 }
 0x1e4   : > { %v3136_v16 = vpop.eup %3135  ;;  %2017 = vst [vmem:[%s3849_s23 + $0x108] sm:$0xff] %v3134_v19  ;;  %3161 = vrcp.f32 %v1703_v14 }
 0x1e5   : > { %v3138_v25 = vpop.eup %3137  ;;  %2081 = vst [vmem:[%s3849_s23 + $0x308] sm:$0xff] %v3136_v16  ;;  %3163 = vrcp.f32 %v1638_v20  ;;  %v2730_v19 = vpop.f32.mrf.mxu1  ;;  %v2352_v22 = vmul.f32 -1.442695, %v1198_v11 }
 0x1e6   : > { %v3140_v31 = vpop.eup %3139  ;;  %2016 = vst [vmem:[%s3849_s23 + $0x100] sm:$0xff] %v3138_v25  ;;  %3165 = vpow2.f32 %v2283_v2  ;;  %v689_v2 = vpop.f32.mrf.mxu0 }
 0x1e7   : > { %v3142_v36 = vpop.eup %3141  ;;  %2080 = vst [vmem:[%s3849_s23 + $0x300] sm:$0xff] %v3140_v31  ;;  %3167 = vpow2.f32 %v2347_v6  ;;  %v2353_v6 = vmul.f32 -1.442695, %v1199_v58  ;;  %v1019_v31 = vpop.f32.mrf.mxu1 }
 0x1e8   : > { %v3144_v40 = vpop.eup %3143  ;;  %v1702_v41 = vadd.f32 1.0, %v3142_v36  ;;  %3169 = vpow2.f32 %v2282_v23  ;;  %v2634_v12 = vpop.f32.mrf.mxu0 }
 0x1e9   : > { %v3146_v44 = vpop.eup %3145  ;;  %2019 = vst [vmem:[%s3849_s23 + $0x118] sm:$0xff] %v3144_v40  ;;  %3171 = vpow2.f32 %v2346_v26  ;;  %v695_v26 = vadd.f32 %v3933_v29, %v2631_v52  ;;  %v705_v48 = vadd.f32 %v3933_v29, %v2634_v12 }
 0x1ea   : > { %v3148_v49 = vpop.eup %3147  ;;  %2083 = vst [vmem:[%s3849_s23 + $0x318] sm:$0xff] %v3146_v44  ;;  %3173 = vrcp.f32 %v1702_v41  ;;  %v699_v16 = vpop.f32.mrf.mxu0  ;;  %v1201_v41 = vsub.f32 0.0, %v1015_v27  ;;  %v1010_v44 = vadd.f32 %v3933_v29, %v1009_v9 }
 0x1eb   : > { %v3150_v53 = vpop.eup %3149  ;;  %2018 = vst [vmem:[%s3849_s23 + $0x110] sm:$0xff] %v3148_v49  ;;  %3175 = vpow2.f32 %v2285_v32  ;;  %v1137_v40 = vsub.f32 0.0, %v695_v26  ;;  %v700_v61 = vadd.f32 %v3933_v29, %v699_v16  ;;  %v1139_v1 = vsub.f32 0.0, %v705_v48 }
 0x1ec   : > { %v3152_v56 = vpop.eup %3151  ;;  %2082 = vst [vmem:[%s3849_s23 + $0x310] sm:$0xff] %v3150_v53  ;;  %3177 = vpow2.f32 %v2349_v37  ;;  %v2637_v34 = vpop.f32.mrf.mxu0  ;;  %v690_v37 = vadd.f32 %v3933_v29, %v689_v2  ;;  %v1025_v53 = vadd.f32 %v3933_v29, %v2730_v19  ;;  %v1020_v2 = vadd.f32 %v3933_v29, %v1019_v31 }
 0x1ed   : > { %v3154_v59 = vpop.eup %3153  ;;  %2021 = vst [vmem:[%s3849_s23 + $0x128] sm:$0xff] %v3152_v56  ;;  %3179 = vpow2.f32 %v2284_v45  ;;  %v2733_v45 = vpop.f32.mrf.mxu1  ;;  %v2291_v56 = vmul.f32 -1.442695, %v1137_v40 }
 0x1ee   : > { %v3156_v63 = vpop.eup %3155  ;;  %2085 = vst [vmem:[%s3849_s23 + $0x328] sm:$0xff] %v3154_v59  ;;  %3181 = vpow2.f32 %v2348_v50  ;;  %v709_v49 = vpop.f32.mrf.mxu0  ;;  %v1136_v52 = vsub.f32 0.0, %v690_v37  ;;  %v1202_v19 = vsub.f32 0.0, %v1020_v2 }
 0x1ef   : > { %v3158_v3 = vpop.eup %3157  ;;  %2020 = vst [vmem:[%s3849_s23 + $0x120] sm:$0xff] %v3156_v63  ;;  %3183 = vpow2.f32 %v2287_v54  ;;  %v1029_v62 = vpop.f32.mrf.mxu1 }
 0x1f0   : > { %v3160_v5 = vpop.eup %3159  ;;  %2084 = vst [vmem:[%s3849_s23 + $0x320] sm:$0xff] %v3158_v3  ;;  %3185 = vpow2.f32 %v2351_v57  ;;  %v2355_v57 = vmul.f32 -1.442695, %v1201_v41  ;;  %v2640_v3 = vpop.f32.mrf.mxu0  ;;  %v2290_v9 = vmul.f32 -1.442695, %v1136_v52 }
 0x1f1   : > { %v3162_v7 = vpop.eup %3161  ;;  %2023 = vst [vmem:[%s3849_s23 + $0x138] sm:$0xff] %v3160_v5  ;;  %3187 = vpow2.f32 %v2286_v60  ;;  %v1200_v60 = vsub.f32 0.0, %v1010_v44 }
 0x1f2   : > { %v3164_v10 = vpop.eup %3163  ;;  %2087 = vst [vmem:[%s3849_s23 + $0x338] sm:$0xff] %v3162_v7  ;;  %3189 = vpow2.f32 %v2350_v0  ;;  %v715_v7 = vadd.f32 %v3933_v29, %v2637_v34 }
 0x1f3   : > { %v3166_v13 = vpop.eup %3165  ;;  %2022 = vst [vmem:[%s3849_s23 + $0x130] sm:$0xff] %v3164_v10  ;;  %3191 = vpow2.f32 %v2289_v4  ;;  %v1035_v10 = vadd.f32 %v3933_v29, %v2733_v45  ;;  %v2354_v12 = vmul.f32 -1.442695, %v1200_v60 }
 0x1f4   : > { %v3168_v14 = vpop.eup %3167  ;;  %v1641_v15 = vadd.f32 1.0, %v3166_v13  ;;  %3193 = vpow2.f32 %v2353_v6  ;;  %v1203_v6 = vsub.f32 0.0, %v1025_v53  ;;  %v1138_v13 = vsub.f32 0.0, %v700_v61 }
 0x1f5   : > { %v3170_v17 = vpop.eup %3169  ;;  %v1705_v18 = vadd.f32 1.0, %v3168_v14  ;;  %3195 = vpow2.f32 %v2288_v8  ;;  %v710_v14 = vadd.f32 %v3933_v29, %v709_v49  ;;  %v1205_v27 = vsub.f32 0.0, %v1035_v10  ;;  %v4038_v10 = vld [vmem:[#allocation7] ss:$0 sm:$0xff] }
 0x1f6   : > { %v3172_v20 = vpop.eup %3171  ;;  %3197 = vrcp.f32 %v1641_v15  ;;  %v1640_v21 = vadd.f32 1.0, %v3170_v17  ;;  %v2736_v15 = vpop.f32.mrf.mxu1  ;;  %v2357_v16 = vmul.f32 -1.442695, %v1203_v6  ;;  %v2292_v31 = vmul.f32 -1.442695, %v1138_v13 }
 0x1f7   : > { %v3174_v23 = vpop.eup %3173  ;;  %3199 = vrcp.f32 %v1705_v18  ;;  %v1704_v24 = vadd.f32 1.0, %v3172_v20  ;;  %v2293_v18 = vmul.f32 -1.442695, %v1139_v1  ;;  %v1030_v20 = vadd.f32 %v3933_v29, %v1029_v62 }
 0x1f8   : > { %v3176_v25 = vpop.eup %3175  ;;  %2086 = vst [vmem:[%s3849_s23 + $0x330] sm:$0xff] %v3174_v23  ;;  %3201 = vrcp.f32 %v1640_v21  ;;  %v719_v21 = vpop.f32.mrf.mxu0  ;;  %v1141_v23 = vsub.f32 0.0, %v715_v7 }
 0x1f9   : > { %v3178_v28 = vpop.eup %3177  ;;  %3203 = vrcp.f32 %v1704_v24  ;;  %v1643_v30 = vadd.f32 1.0, %v3176_v25  ;;  %v725_v24 = vadd.f32 %v3933_v29, %v2640_v3  ;;  %v1039_v34 = vpop.f32.mrf.mxu1  ;;  %v1204_v37 = vsub.f32 0.0, %v1030_v20 }
 0x1fa   : > { %v3180_v32 = vpop.eup %3179  ;;  %v1707_v33 = vadd.f32 1.0, %v3178_v28  ;;  %3205 = vpow2.f32 %v2352_v22  ;;  %v1045_v28 = vadd.f32 %v3933_v29, %v2736_v15  ;;  %v2295_v40 = vmul.f32 -1.442695, %v1141_v23 }
 0x1fb   : > { %v3182_v35 = vpop.eup %3181  ;;  %3207 = vrcp.f32 %v1643_v30  ;;  %v1642_v36 = vadd.f32 1.0, %v3180_v32  ;;  %v1140_v32 = vsub.f32 0.0, %v710_v14  ;;  %v1143_v41 = vsub.f32 0.0, %v725_v24  ;;  %v2739_v48 = vpop.f32.mrf.mxu1 }
 0x1fc   : > { %v3184_v38 = vpop.eup %3183  ;;  %3209 = vrcp.f32 %v1707_v33  ;;  %v1706_v39 = vadd.f32 1.0, %v3182_v35  ;;  %v720_v33 = vadd.f32 %v3933_v29, %v719_v21  ;;  %v1207_v44 = vsub.f32 0.0, %v1045_v28 }
 0x1fd   : > { %v3186_v42 = vpop.eup %3185  ;;  %3211 = vrcp.f32 %v1642_v36  ;;  %v1645_v43 = vadd.f32 1.0, %v3184_v38  ;;  %v2356_v36 = vmul.f32 -1.442695, %v1202_v19  ;;  %v2643_v38 = vpop.f32.mrf.mxu0  ;;  %v1055_v13 = vadd.f32 %v4038_v10, %v2739_v48 }
 0x1fe   : > { %v3188_v46 = vpop.eup %3187  ;;  %3213 = vrcp.f32 %v1706_v39  ;;  %v1709_v47 = vadd.f32 1.0, %v3186_v42 }
 0x1ff   : > { %v3190_v50 = vpop.eup %3189  ;;  %3215 = vrcp.f32 %v1645_v43  ;;  %v1644_v51 = vadd.f32 1.0, %v3188_v46  ;;  %v2359_v43 = vmul.f32 -1.442695, %v1205_v27  ;;  %v2294_v46 = vmul.f32 -1.442695, %v1140_v32  ;;  %v729_v52 = vpop.f32.mrf.mxu0 }
 0x200   : > { %v3192_v54 = vpop.eup %3191  ;;  %3217 = vrcp.f32 %v1709_v47  ;;  %v1708_v55 = vadd.f32 1.0, %v3190_v50  ;;  %v1142_v47 = vsub.f32 0.0, %v720_v33  ;;  %v2358_v50 = vmul.f32 -1.442695, %v1204_v37 }
 0x201   : > { %v3194_v58 = vpop.eup %3193  ;;  %3219 = vrcp.f32 %v1644_v51  ;;  %v1647_v59 = vadd.f32 1.0, %v3192_v54  ;;  %v1040_v51 = vadd.f32 %v3933_v29, %v1039_v34  ;;  %v2297_v54 = vmul.f32 -1.442695, %v1143_v41  ;;  %v2646_v61 = vpop.f32.mrf.mxu0 }
 0x202   : > { %v3196_v63 = vpop.eup %3195  ;;  %3221 = vrcp.f32 %v1708_v55  ;;  %v1711_v0 = vadd.f32 1.0, %v3194_v58  ;;  %v2296_v58 = vmul.f32 -1.442695, %v1142_v47  ;;  %v745_v34 = vadd.f32 %v4038_v10, %v2646_v61 }
 0x203   : > { %v3198_v4 = vpop.eup %3197  ;;  %3223 = vrcp.f32 %v1647_v59  ;;  %v1646_v5 = vadd.f32 1.0, %v3196_v63  ;;  %v1049_v59 = vpop.f32.mrf.mxu1  ;;  %v1206_v29 = vsub.f32 0.0, %v1040_v51 }
 0x204   : > { %v3200_v8 = vpop.eup %3199  ;;  %2025 = vst [vmem:[%s3849_s23 + $0x148] sm:$0xff] %v3198_v4  ;;  %3225 = vrcp.f32 %v1711_v0  ;;  %v739_v7 = vpop.f32.mrf.mxu0  ;;  %v1147_v51 = vsub.f32 0.0, %v745_v34 }
 0x205   : > { %v3202_v11 = vpop.eup %3201  ;;  %2089 = vst [vmem:[%s3849_s23 + $0x348] sm:$0xff] %v3200_v8  ;;  %3227 = vrcp.f32 %v1646_v5  ;;  %v2742_v3 = vpop.f32.mrf.mxu1  ;;  %v2360_v6 = vmul.f32 -1.442695, %v1206_v29  ;;  %v740_v47 = vadd.f32 %v4038_v10, %v739_v7 }
 0x206   : > { %v3204_v17 = vpop.eup %3203  ;;  %2024 = vst [vmem:[%s3849_s23 + $0x140] sm:$0xff] %v3202_v11  ;;  %3229 = vpow2.f32 %v2291_v56  ;;  %v2361_v56 = vmul.f32 -1.442695, %v1207_v44  ;;  %v735_v11 = vadd.f32 %v4038_v10, %v2643_v38  ;;  %v2649_v20 = vpop.f32.mrf.mxu0 }
 0x207   : > { %v3206_v22 = vpop.eup %3205  ;;  %2088 = vst [vmem:[%s3849_s23 + $0x340] sm:$0xff] %v3204_v17  ;;  %3231 = vpow2.f32 %v2355_v57  ;;  %v1059_v17 = vpop.f32.mrf.mxu1 }
 0x208   : > { %v3208_v25 = vpop.eup %3207  ;;  %v1710_v26 = vadd.f32 1.0, %v3206_v22  ;;  %3233 = vpow2.f32 %v2290_v9 }
 0x209   : > { %v3210_v30 = vpop.eup %3209  ;;  %2027 = vst [vmem:[%s3849_s23 + $0x158] sm:$0xff] %v3208_v25  ;;  %3235 = vpow2.f32 %v2354_v12  ;;  %v1209_v25 = vsub.f32 0.0, %v1055_v13 }
 0x20a   : > { %v3212_v35 = vpop.eup %3211  ;;  %2091 = vst [vmem:[%s3849_s23 + $0x358] sm:$0xff] %v3210_v30  ;;  %3237 = vrcp.f32 %v1710_v26  ;;  %v730_v26 = vadd.f32 %v4038_v10, %v729_v52  ;;  %v1050_v30 = vadd.f32 %v4038_v10, %v1049_v59  ;;  %v1060_v52 = vadd.f32 %v4038_v10, %v1059_v17 }
 0x20b   : > { %v3214_v39 = vpop.eup %3213  ;;  %2026 = vst [vmem:[%s3849_s23 + $0x150] sm:$0xff] %v3212_v35  ;;  %3239 = vpow2.f32 %v2293_v18  ;;  %v749_v35 = vpop.f32.mrf.mxu0 }
 0x20c   : > { %v3216_v42 = vpop.eup %3215  ;;  %2090 = vst [vmem:[%s3849_s23 + $0x350] sm:$0xff] %v3214_v39  ;;  %3241 = vpow2.f32 %v2357_v16  ;;  %v1145_v16 = vsub.f32 0.0, %v735_v11  ;;  %v1065_v39 = vadd.f32 %v4038_v10, %v2742_v3  ;;  %v1210_v3 = vsub.f32 0.0, %v1060_v52 }
 0x20d   : > { %v3218_v45 = vpop.eup %3217  ;;  %2029 = vst [vmem:[%s3849_s23 + $0x168] sm:$0xff] %v3216_v42  ;;  %3243 = vpow2.f32 %v2292_v31  ;;  %v2745_v31 = vpop.f32.mrf.mxu1  ;;  %v2363_v42 = vmul.f32 -1.442695, %v1209_v25 }
 0x20e   : > { %v3220_v49 = vpop.eup %3219  ;;  %2093 = vst [vmem:[%s3849_s23 + $0x368] sm:$0xff] %v3218_v45  ;;  %3245 = vpow2.f32 %v2356_v36  ;;  %v2299_v38 = vmul.f32 -1.442695, %v1145_v16 }
 0x20f   : > { %v3222_v53 = vpop.eup %3221  ;;  %2028 = vst [vmem:[%s3849_s23 + $0x160] sm:$0xff] %v3220_v49  ;;  %3247 = vpow2.f32 %v2295_v40  ;;  %v1069_v48 = vpop.f32.mrf.mxu1 }
 0x210   : > { %v3224_v55 = vpop.eup %3223  ;;  %2092 = vst [vmem:[%s3849_s23 + $0x360] sm:$0xff] %v3222_v53  ;;  %3249 = vpow2.f32 %v2359_v43  ;;  %v1144_v43 = vsub.f32 0.0, %v730_v26  ;;  %v2652_v53 = vpop.f32.mrf.mxu0 }
 0x211   : > { %v3226_v57 = vpop.eup %3225  ;;  %2031 = vst [vmem:[%s3849_s23 + $0x178] sm:$0xff] %v3224_v55  ;;  %3251 = vpow2.f32 %v2294_v46  ;;  %v1208_v46 = vsub.f32 0.0, %v1050_v30 }
 0x212   : > { %v3228_v60 = vpop.eup %3227  ;;  %2095 = vst [vmem:[%s3849_s23 + $0x378] sm:$0xff] %v3226_v57  ;;  %3253 = vpow2.f32 %v2358_v50  ;;  %v755_v57 = vadd.f32 %v4038_v10, %v2649_v20  ;;  %v2298_v59 = vmul.f32 -1.442695, %v1144_v43 }
 0x213   : > { %v3230_v62 = vpop.eup %3229  ;;  %2030 = vst [vmem:[%s3849_s23 + $0x170] sm:$0xff] %v3228_v60  ;;  %3255 = vpow2.f32 %v2297_v54  ;;  %v1075_v60 = vadd.f32 %v4038_v10, %v2745_v31  ;;  %v2362_v61 = vmul.f32 -1.442695, %v1208_v46 }
 0x214   : > { %v3232_v63 = vpop.eup %3231  ;;  %v1649_v0 = vadd.f32 1.0, %v3230_v62  ;;  %3257 = vpow2.f32 %v2361_v56  ;;  %v1211_v56 = vsub.f32 0.0, %v1065_v39  ;;  %v1146_v62 = vsub.f32 0.0, %v740_v47 }
 0x215   : > { %v3234_v1 = vpop.eup %3233  ;;  %v1713_v2 = vadd.f32 1.0, %v3232_v63  ;;  %3259 = vpow2.f32 %v2296_v58  ;;  %v750_v63 = vadd.f32 %v4038_v10, %v749_v35  ;;  %v1213_v13 = vsub.f32 0.0, %v1075_v60 }
 0x216   : > { %v3236_v4 = vpop.eup %3235  ;;  %3261 = vrcp.f32 %v1649_v0  ;;  %v1648_v5 = vadd.f32 1.0, %v3234_v1  ;;  %v2748_v0 = vpop.f32.mrf.mxu1  ;;  %v2365_v7 = vmul.f32 -1.442695, %v1211_v56  ;;  %v2300_v17 = vmul.f32 -1.442695, %v1146_v62 }
 0x217   : > { %v3238_v8 = vpop.eup %3237  ;;  %3263 = vrcp.f32 %v1713_v2  ;;  %v1712_v9 = vadd.f32 1.0, %v3236_v4  ;;  %v2301_v2 = vmul.f32 -1.442695, %v1147_v51  ;;  %v1070_v4 = vadd.f32 %v4038_v10, %v1069_v48 }
 0x218   : > { %v3240_v12 = vpop.eup %3239  ;;  %2094 = vst [vmem:[%s3849_s23 + $0x370] sm:$0xff] %v3238_v8  ;;  %3265 = vrcp.f32 %v1648_v5  ;;  %v759_v5 = vpop.f32.mrf.mxu0  ;;  %v1149_v8 = vsub.f32 0.0, %v755_v57 }
 0x219   : > { %v3242_v14 = vpop.eup %3241  ;;  %3267 = vrcp.f32 %v1712_v9  ;;  %v1651_v15 = vadd.f32 1.0, %v3240_v12  ;;  %v765_v9 = vadd.f32 %v4038_v10, %v2652_v53  ;;  %v1079_v25 = vpop.f32.mrf.mxu1 }
 0x21a   : > { %v3244_v18 = vpop.eup %3243  ;;  %v1715_v19 = vadd.f32 1.0, %v3242_v14  ;;  %3269 = vpow2.f32 %v2360_v6  ;;  %v1085_v14 = vadd.f32 %v4038_v10, %v2748_v0  ;;  %v1080_v35 = vadd.f32 %v4038_v10, %v1079_v25 }
 0x21b   : > { %v3246_v21 = vpop.eup %3245  ;;  %3271 = vrcp.f32 %v1651_v15  ;;  %v1650_v22 = vadd.f32 1.0, %v3244_v18  ;;  %v1148_v18 = vsub.f32 0.0, %v750_v63 }
 0x21c   : > { %v3248_v23 = vpop.eup %3247  ;;  %3273 = vrcp.f32 %v1715_v19  ;;  %v1714_v24 = vadd.f32 1.0, %v3246_v21  ;;  %v760_v19 = vadd.f32 %v4038_v10, %v759_v5  ;;  %v2364_v21 = vmul.f32 -1.442695, %v1210_v3 }
 0x21d   : > { %v3250_v27 = vpop.eup %3249  ;;  %3275 = vrcp.f32 %v1650_v22  ;;  %v1653_v28 = vadd.f32 1.0, %v3248_v23  ;;  %v1212_v22 = vsub.f32 0.0, %v1070_v4  ;;  %v2303_v23 = vmul.f32 -1.442695, %v1149_v8 }
 0x21e   : > { %v3252_v32 = vpop.eup %3251  ;;  %3277 = vrcp.f32 %v1714_v24  ;;  %v1717_v33 = vadd.f32 1.0, %v3250_v27  ;;  %v1151_v24 = vsub.f32 0.0, %v765_v9  ;;  %v2367_v27 = vmul.f32 -1.442695, %v1213_v13 }
 0x21f   : > { %v3254_v36 = vpop.eup %3253  ;;  %3279 = vrcp.f32 %v1653_v28  ;;  %v1652_v37 = vadd.f32 1.0, %v3252_v32  ;;  %v1215_v28 = vsub.f32 0.0, %v1085_v14  ;;  %v2302_v31 = vmul.f32 -1.442695, %v1148_v18 }
 0x220   : > { %v3256_v40 = vpop.eup %3255  ;;  %3281 = vrcp.f32 %v1717_v33  ;;  %v1716_v41 = vadd.f32 1.0, %v3254_v36  ;;  %v1150_v32 = vsub.f32 0.0, %v760_v19  ;;  %v2366_v34 = vmul.f32 -1.442695, %v1212_v22 }
 0x221   : > { %v3258_v44 = vpop.eup %3257  ;;  %3283 = vrcp.f32 %v1652_v37  ;;  %v1655_v45 = vadd.f32 1.0, %v3256_v40  ;;  %v2305_v37 = vmul.f32 -1.442695, %v1151_v24  ;;  %v2369_v39 = vmul.f32 -1.442695, %v1215_v28 }
 0x222   : > { %v3260_v49 = vpop.eup %3259  ;;  %3285 = vrcp.f32 %v1716_v41  ;;  %v1719_v50 = vadd.f32 1.0, %v3258_v44  ;;  %v2304_v41 = vmul.f32 -1.442695, %v1150_v32  ;;  %v1214_v43 = vsub.f32 0.0, %v1080_v35 }
 0x223   : > { %v3262_v54 = vpop.eup %3261  ;;  %3287 = vrcp.f32 %v1655_v45  ;;  %v1654_v55 = vadd.f32 1.0, %v3260_v49 }
 0x224   : > { %v3264_v58 = vpop.eup %3263  ;;  %2033 = vst [vmem:[%s3849_s23 + $0x188] sm:$0xff] %v3262_v54  ;;  %3289 = vrcp.f32 %v1719_v50  ;;  %v2368_v50 = vmul.f32 -1.442695, %v1214_v43 }
 0x225   : > { %v3266_v29 = vpop.eup %3265  ;;  %2097 = vst [vmem:[%s3849_s23 + $0x388] sm:$0xff] %v3264_v58  ;;  %3291 = vrcp.f32 %v1654_v55 }
 0x226   : > { %v3268_v1 = vpop.eup %3267  ;;  %2032 = vst [vmem:[%s3849_s23 + $0x180] sm:$0xff] %v3266_v29  ;;  %3293 = vpow2.f32 %v2299_v38 }
 0x227   : > { %v3270_v6 = vpop.eup %3269  ;;  %2096 = vst [vmem:[%s3849_s23 + $0x380] sm:$0xff] %v3268_v1  ;;  %3295 = vpow2.f32 %v2363_v42 }
 0x228   : > { %v3272_v11 = vpop.eup %3271  ;;  %v1718_v12 = vadd.f32 1.0, %v3270_v6  ;;  %3297 = vpow2.f32 %v2298_v59 }
 0x229   : > { %v3274_v15 = vpop.eup %3273  ;;  %2035 = vst [vmem:[%s3849_s23 + $0x198] sm:$0xff] %v3272_v11  ;;  %3299 = vpow2.f32 %v2362_v61 }
 0x22a   : > { %v3276_v20 = vpop.eup %3275  ;;  %2099 = vst [vmem:[%s3849_s23 + $0x398] sm:$0xff] %v3274_v15  ;;  %3301 = vrcp.f32 %v1718_v12 }
 0x22b   : > { %v3278_v16 = vpop.eup %3277  ;;  %2034 = vst [vmem:[%s3849_s23 + $0x190] sm:$0xff] %v3276_v20  ;;  %3303 = vpow2.f32 %v2301_v2 }
 0x22c   : > { %v3280_v26 = vpop.eup %3279  ;;  %2098 = vst [vmem:[%s3849_s23 + $0x390] sm:$0xff] %v3278_v16  ;;  %3305 = vpow2.f32 %v2365_v7 }
 0x22d   : > { %v3282_v30 = vpop.eup %3281  ;;  %2037 = vst [vmem:[%s3849_s23 + $0x1a8] sm:$0xff] %v3280_v26  ;;  %3307 = vpow2.f32 %v2300_v17 }
 0x22e   : > { %v3284_v33 = vpop.eup %3283  ;;  %2101 = vst [vmem:[%s3849_s23 + $0x3a8] sm:$0xff] %v3282_v30  ;;  %3309 = vpow2.f32 %v2364_v21 }
 0x22f   : > { %v3286_v36 = vpop.eup %3285  ;;  %2036 = vst [vmem:[%s3849_s23 + $0x1a0] sm:$0xff] %v3284_v33  ;;  %3311 = vpow2.f32 %v2303_v23 }
 0x230   : > { %v3288_v38 = vpop.eup %3287  ;;  %2100 = vst [vmem:[%s3849_s23 + $0x3a0] sm:$0xff] %v3286_v36  ;;  %3313 = vpow2.f32 %v2367_v27 }
 0x231   : > { %v3290_v40 = vpop.eup %3289  ;;  %2039 = vst [vmem:[%s3849_s23 + $0x1b8] sm:$0xff] %v3288_v38  ;;  %3315 = vpow2.f32 %v2302_v31 }
 0x232   : > { %v3292_v42 = vpop.eup %3291  ;;  %2103 = vst [vmem:[%s3849_s23 + $0x3b8] sm:$0xff] %v3290_v40  ;;  %3317 = vpow2.f32 %v2366_v34 }
 0x233   : > { %v3294_v44 = vpop.eup %3293  ;;  %2038 = vst [vmem:[%s3849_s23 + $0x1b0] sm:$0xff] %v3292_v42  ;;  %3319 = vpow2.f32 %v2305_v37 }
 0x234   : > { %v3296_v10 = vpop.eup %3295  ;;  %v1657_v45 = vadd.f32 1.0, %v3294_v44  ;;  %3321 = vpow2.f32 %v2369_v39 }
 0x235   : > { %v3298_v46 = vpop.eup %3297  ;;  %v1721_v47 = vadd.f32 1.0, %v3296_v10  ;;  %3323 = vpow2.f32 %v2304_v41 }
 0x236   : > { %v3300_v48 = vpop.eup %3299  ;;  %3325 = vrcp.f32 %v1657_v45  ;;  %v1656_v49 = vadd.f32 1.0, %v3298_v46 }
 0x237   : > { %v3302_v51 = vpop.eup %3301  ;;  %3327 = vrcp.f32 %v1721_v47  ;;  %v1720_v52 = vadd.f32 1.0, %v3300_v48 }
 0x238   : > { %v3304_v53 = vpop.eup %3303  ;;  %2102 = vst [vmem:[%s3849_s23 + $0x3b0] sm:$0xff] %v3302_v51  ;;  %3329 = vrcp.f32 %v1656_v49 }
 0x239   : > { %v3306_v54 = vpop.eup %3305  ;;  %3331 = vrcp.f32 %v1720_v52  ;;  %v1659_v55 = vadd.f32 1.0, %v3304_v53 }
 0x23a   : > { %v3308_v56 = vpop.eup %3307  ;;  %v1723_v57 = vadd.f32 1.0, %v3306_v54  ;;  %3333 = vpow2.f32 %v2368_v50 }
 0x23b   : > { %v3310_v58 = vpop.eup %3309  ;;  %3335 = vrcp.f32 %v1659_v55  ;;  %v1658_v59 = vadd.f32 1.0, %v3308_v56 }
 0x23c   : > { %v3312_v60 = vpop.eup %3311  ;;  %3337 = vrcp.f32 %v1723_v57  ;;  %v1722_v29 = vadd.f32 1.0, %v3310_v58 }
 0x23d   : > { %v3314_v61 = vpop.eup %3313  ;;  %3339 = vrcp.f32 %v1658_v59  ;;  %v1661_v62 = vadd.f32 1.0, %v3312_v60 }
 0x23e   : > { %v3316_v63 = vpop.eup %3315  ;;  %3341 = vrcp.f32 %v1722_v29  ;;  %v1725_v0 = vadd.f32 1.0, %v3314_v61 }
 0x23f   : > { %v3318_v1 = vpop.eup %3317  ;;  %3343 = vrcp.f32 %v1661_v62  ;;  %v1660_v2 = vadd.f32 1.0, %v3316_v63 }
 0x240   : > { %v3320_v3 = vpop.eup %3319  ;;  %3345 = vrcp.f32 %v1725_v0  ;;  %v1724_v4 = vadd.f32 1.0, %v3318_v1 }
 0x241   : > { %v3322_v5 = vpop.eup %3321  ;;  %3347 = vrcp.f32 %v1660_v2  ;;  %v1663_v6 = vadd.f32 1.0, %v3320_v3 }
 0x242   : > { %v3324_v7 = vpop.eup %3323  ;;  %3349 = vrcp.f32 %v1724_v4  ;;  %v1727_v8 = vadd.f32 1.0, %v3322_v5 }
 0x243   : > { %v3326_v9 = vpop.eup %3325  ;;  %3351 = vrcp.f32 %v1663_v6  ;;  %v1662_v11 = vadd.f32 1.0, %v3324_v7 }
 0x244   : > { %v3328_v12 = vpop.eup %3327  ;;  %2041 = vst [vmem:[%s3849_s23 + $0x1c8] sm:$0xff] %v3326_v9  ;;  %3353 = vrcp.f32 %v1727_v8 }
 0x245   : > { %v3330_v13 = vpop.eup %3329  ;;  %2105 = vst [vmem:[%s3849_s23 + $0x3c8] sm:$0xff] %v3328_v12  ;;  %3355 = vrcp.f32 %v1662_v11 }
 0x246   : > { %v3332_v14 = vpop.eup %3331  ;;  %2040 = vst [vmem:[%s3849_s23 + $0x1c0] sm:$0xff] %v3330_v13 }
 0x247   : > { %v3334_v15 = vpop.eup %3333  ;;  %2104 = vst [vmem:[%s3849_s23 + $0x3c0] sm:$0xff] %v3332_v14 }
 0x248   : > { %v3336_v17 = vpop.eup %3335  ;;  %v1726_v18 = vadd.f32 1.0, %v3334_v15 }
 0x249   : > { %v3338_v19 = vpop.eup %3337  ;;  %2043 = vst [vmem:[%s3849_s23 + $0x1d8] sm:$0xff] %v3336_v17 }
 0x24a   : > { %v3340_v20 = vpop.eup %3339  ;;  %2107 = vst [vmem:[%s3849_s23 + $0x3d8] sm:$0xff] %v3338_v19  ;;  %3357 = vrcp.f32 %v1726_v18 }
 0x24b   : > { %v3342_v21 = vpop.eup %3341  ;;  %2042 = vst [vmem:[%s3849_s23 + $0x1d0] sm:$0xff] %v3340_v20 }
 0x24c   : > { %v3344_v22 = vpop.eup %3343  ;;  %2106 = vst [vmem:[%s3849_s23 + $0x3d0] sm:$0xff] %v3342_v21 }
 0x24d   : > { %v3346_v16 = vpop.eup %3345  ;;  %2045 = vst [vmem:[%s3849_s23 + $0x1e8] sm:$0xff] %v3344_v22 }
 0x24e   : > { %v3348_v23 = vpop.eup %3347  ;;  %2109 = vst [vmem:[%s3849_s23 + $0x3e8] sm:$0xff] %v3346_v16 }
 0x24f   : > { %v3350_v24 = vpop.eup %3349  ;;  %2044 = vst [vmem:[%s3849_s23 + $0x1e0] sm:$0xff] %v3348_v23 }
 0x250   : > { %v3352_v25 = vpop.eup %3351  ;;  %2108 = vst [vmem:[%s3849_s23 + $0x3e0] sm:$0xff] %v3350_v24 }
 0x251   : > { %v3354_v26 = vpop.eup %3353  ;;  %2047 = vst [vmem:[%s3849_s23 + $0x1f8] sm:$0xff] %v3352_v25 }
 0x252   : > { %v3356_v27 = vpop.eup %3355  ;;  %2111 = vst [vmem:[%s3849_s23 + $0x3f8] sm:$0xff] %v3354_v26 }
 0x253   : > { %2046 = vst [vmem:[%s3849_s23 + $0x1f0] sm:$0xff] %v3356_v27 }
 0x254   : > { %2119 = sbr.rel (!%p4163_p6) target bundleno = 628 (0x274), region = 48 }
 0x257   : > { %v3358_v28 = vpop.eup %3357 }
 0x258   : > { %2110 = vst [vmem:[%s3849_s23 + $0x3f0] sm:$0xff] %v3358_v28 }
 0x259   : > { %s4172_s6 = smov (!%p2122_p0, %s2121_s6), 128 }
 0x25a   : > { %s4093_s9 = sshll.u32 %s4172_s6, 7 }
 0x25b   : > { %s2126_s10 = ssub.s32 16384, %s4093_s9 }
 0x25c   : > { %2127 = vsyncadd %s2113_s26, %s2126_s10  ;;  %p2373_p3 = scmp.ne.s32.totalorder %s4093_s9, 0  ;;  %s2380_s24 = sshll.u32 %s3560_s16, 14 }
 0x25d   : > { %s4103_s30 = scalar_lea.hbm %s4153_s3, %s2380_s24  ;;  %s2132_s29 = sshll.u32 %s3849_s23, 4  ;;  %s4106_s29 = int_to_ptr.vmem [resolvable:$true] %s2132_s29 }
 0x25e   : > { %s3439_s4 = scalar_lea.vmem %s4106_s29, %s4093_s9  ;;  %s3516_s22 = smov [#allocation8]  }
 0x25f   : > { %p3440_p7 = scmp.ne.s32.totalorder %s4106_s29, %s3439_s4  ;;  %s3443_s7 = sshll.u32 %s3516_s22, 4  ;;  %s3444_s7 = int_to_ptr.vmem [resolvable:$false] %s3443_s7 }
 0x260   : > { %s3445_s16 = scalar_lea.vmem %s3444_s7, 32768  ;;  %p3446_p8 = scmp.lt.s32.totalorder %s4106_s29, %s3444_s7 }
 0x261   : > { %p3441_p9 = pnand %p3440_p7, %p2373_p3  ;;  %p3447_p10 = scmp.lt.s32.totalorder %s3445_s16, %s3439_s4 }
 0x263   : > { %p3442_p12 = pneg %p3441_p9  ;;  %p3448_p4 = por %p3447_p10, %p3446_p8 }
 0x265   : > { %p3449_p11 = pnand %p3448_p4, %p3442_p12 }
 0x267   : > { %3452 = shalt.err (!%p3449_p11)
}
 0x268   : > { %s3453_s8 = scalar_lea.hbm %s4103_s30, %s4093_s9  ;;  %s3457_s20 = scalar_lea.hbm %s4153_s3, 65664 }
 0x269   : > { %p3454_p2 = scmp.ne.s32.totalorder %s4103_s30, %s3453_s8  ;;  %p3458_p13 = scmp.lt.s32.totalorder %s4103_s30, %s4153_s3 }
 0x26a   : > { %p3459_p6 = scmp.lt.s32.totalorder %s3457_s20, %s3453_s8 }
 0x26b   : > { %p3455_p1 = pnand %p3454_p2, %p2373_p3 }
 0x26c   : > { %p3460_p0 = por %p3459_p6, %p3458_p13 }
 0x26d   : > { %p3456_p5 = pneg %p3455_p1 }
 0x26f   : > { %p3461_p7 = pnand %p3460_p0, %p3456_p5 }
 0x271   : > { %3464 = shalt.err (!%p3461_p7)
}
 0x272   : > { %s3517_s6 = smov 128   ;;  %s3518_s10 = smov 8  }
 0x273   : > { %2138 = dma.vmem_to_hbm [thread:$0]  (%p2373_p3), %s4106_s29, %s4093_s9, %s4103_s30, %s2113_s26, %s3517_s6, %s3517_s6, %s3518_s10  }
 0x274 PF: > { %p2806_p9 = scmp.ge.s32.totalorder %s3507_s15, 2  ;;  %s2147_s24 = sand.u32 1, %s3495_s12  }
 0x275   : > { %p4164_p12 = scmp.ne.s32.totalorder %s4158_s25, 0  ;;  %s2148_s27 = scalar_lea.sflag [#allocation4], %s2147_s24 }
 0x277   : > { %p2799_p8 = pnand %p2806_p9, %p4164_p12 }
 0x279   : > { %p2800_p10 = pneg %p2799_p8 }
 0x27b   : > { %3490 = dma.done.wait (%p2800_p10), %s2148_s27, 16384  }
 0x27c   : > { %3492 = vsyncadd (%p2800_p10), %s2148_s27, 4294950912  ;;  %p17_p4 = scmp.ge.s32.totalorder %s3564_s18, 7   ;;  %s4165_s12 = smov %s3499_s13 }
 0x27d   : > { %s4166_s13 = smov %s3503_s14  ;;  %s4167_s14 = smov %s3576_s21 }
 0x27e   : > { %s4168_s15 = smov %s3564_s18  ;;  %19 = sbr.rel (!%p17_p4) target bundleno = 6 (0x6), region = 85 }
 0x283   :  { %2153 = vsyncpa [#allocation3], 1 }
 0x284   :  { %2155 = vsyncpa [#allocation3 + $0x1], 1 }
 0x285   :  { %2156 = vsyncpa [#allocation6], 1 }
 0x286   :  { %2157 = vsyncpa [#allocation4], 1 }
 0x287   :  { %2159 = vsyncpa [#allocation4 + $0x1], 1 }

</bundles_post_ra>
